<compile_context>
chip_gen: v5e
topology: v5e:2x2
jax: 0.10.0
libtpu: 0.0.40
codegen_flags: <defaults>
</compile_context>

<pallas_src>
import jax
import jax.numpy as jnp
from jax.experimental import pallas as pl
from jax.experimental.pallas import tpu as pltpu

LANE = 128  # lane-dense padded output width


def _multi_head_policy_kernel(x_ref, row_head_ref, w1_ref, b1_ref, w2_ref,
                              b2_ref, o_ref):
    # x_ref:        (M, D_in)      f32   flattened requests (M = NR*B)
    # row_head_ref: (M, 1)         int32 head id for each row
    # w1_ref:       (NH, D_in, H1) f32
    # b1_ref:       (NH, 1, H1)    f32
    # w2_ref:       (NH, H1, H2p)  f32   (output lanes zero-padded to H2p)
    # b2_ref:       (NH, 1, H2p)   f32
    # o_ref:        (M, H2p)       f32
    x = x_ref[...]                                  # (M, D_in)
    rh = row_head_ref[...]                          # (M, 1) int32
    num_heads = w1_ref.shape[0]

    acc = jnp.zeros(o_ref.shape, jnp.float32)       # (M, H2p)
    # Static unroll over the small number of heads (NH = 5): every matmul uses
    # all M = 128 MXU rows; per-row head selection is a cheap VPU select.
    for h in range(num_heads):
        h1 = jnp.tanh(
            jnp.dot(x, w1_ref[h], preferred_element_type=jnp.float32)
            + b1_ref[h]
        )                                           # (M, H1)
        oh = jnp.tanh(
            jnp.dot(h1, w2_ref[h], preferred_element_type=jnp.float32)
            + b2_ref[h]
        )                                           # (M, H2p)
        acc = jnp.where(rh == h, oh, acc)

    o_ref[...] = acc.astype(o_ref.dtype)


@jax.jit
def multi_head_policy_forward(x_stack, head_ids, w1, b1, w2, b2):
    """Batched multi-head policy forward.

    x_stack : (NR, B, D_in) f32   -- NR independent requests of a (B, D_in) batch
    head_ids: (NR,) int           -- head index per request (clamped to range)
    w1      : (NH, D_in, H1) f32  -- per-head layer-1 weights (x @ W convention)
    b1      : (NH, 1, H1)    f32
    w2      : (NH, H1, H2)   f32
    b2      : (NH, 1, H2)    f32
    returns : (NR, B, H2)    f32
    """
    NR, B, D_in = x_stack.shape
    NH, _, H1 = w1.shape
    H2 = w2.shape[-1]
    M = NR * B
    H2p = max(LANE, H2)                 # lane-dense padded output width
    pad = H2p - H2

    head_ids = jnp.clip(head_ids.astype(jnp.int32), 0, NH - 1)
    x2d = x_stack.reshape(M, D_in)
    row_heads = jnp.repeat(head_ids, B).reshape(M, 1)

    # Zero-pad only the output lane dim (keeps tanh(0)=0 in padded lanes).
    w2p = jnp.pad(w2, ((0, 0), (0, 0), (0, pad)))
    b2p = jnp.pad(b2, ((0, 0), (0, 0), (0, pad)))

    out = pl.pallas_call(
        _multi_head_policy_kernel,
        out_shape=jax.ShapeDtypeStruct((M, H2p), x_stack.dtype),
        grid=(1,),
        in_specs=[
            pl.BlockSpec((M, D_in), lambda i: (0, 0)),
            pl.BlockSpec((M, 1), lambda i: (0, 0)),
            pl.BlockSpec((NH, D_in, H1), lambda i: (0, 0, 0)),
            pl.BlockSpec((NH, 1, H1), lambda i: (0, 0, 0)),
            pl.BlockSpec((NH, H1, H2p), lambda i: (0, 0, 0)),
            pl.BlockSpec((NH, 1, H2p), lambda i: (0, 0, 0)),
        ],
        out_specs=pl.BlockSpec((M, H2p), lambda i: (0, 0)),
        compiler_params=pltpu.CompilerParams(
            dimension_semantics=("arbitrary",)
        ),
    )(x2d, row_heads, w1, b1, w2p, b2p)

    return out[:, :H2].reshape(NR, B, H2)


def _init_linear_params(key, num_heads, fan_in, fan_out):
    """PyTorch-style U(-1/sqrt(fan_in), 1/sqrt(fan_in)) init, (x @ W) layout."""
    kw, kb = jax.random.split(key)
    bound = 1.0 / jnp.sqrt(jnp.float32(fan_in))
    w = jax.random.uniform(
        kw, (num_heads, fan_in, fan_out), jnp.float32, minval=-bound, maxval=bound
    )
    b = jax.random.uniform(
        kb, (num_heads, 1, fan_out), jnp.float32, minval=-bound, maxval=bound
    )
    return w, b


def _reference_forward(x, w1, b1, w2, b2, head_idx):
    h = jnp.tanh(x @ w1[head_idx] + b1[head_idx])
    return jnp.tanh(h @ w2[head_idx] + b2[head_idx])


if __name__ == "__main__":
    # Shapes consistent with Multi_head_policy_net(inp_size=32, pi=[32, 32],
    # num_heads=5), batched over 16 independent requests (one head id each).
    batch = 8
    inp_size = 32
    hidden1 = 32
    hidden2 = 32
    num_heads = 5
    num_requests = 16

    key = jax.random.PRNGKey(0)
    kx, k1, k2, kh = jax.random.split(key, 4)

    x_stack = jax.random.normal(
        kx, (num_requests, batch, inp_size), dtype=jnp.float32
    )
    head_ids = jax.random.randint(
        kh, (num_requests,), 0, num_heads, dtype=jnp.int32
    )

    w1, b1 = _init_linear_params(k1, num_heads, inp_size, hidden1)
    w2, b2 = _init_linear_params(k2, num_heads, hidden1, hidden2)

    out = multi_head_policy_forward(x_stack, head_ids, w1, b1, w2, b2)
    out = jax.block_until_ready(out)

    # Pure-JAX reference (per-request head selection).
    ref = jax.vmap(
        lambda xb, hid: _reference_forward(xb, w1, b1, w2, b2, hid)
    )(x_stack, head_ids)

    assert out.shape == (num_requests, batch, hidden2)
    assert jnp.allclose(out, ref, atol=1e-5, rtol=1e-5), \
        "Pallas result mismatch vs reference"

    print("KERNEL_OK")
</pallas_src>

<mosaic_0001>
module attributes {stable_mosaic.version = 11 : i64} {
  func.func @_multi_head_policy_kernel(%arg0: i32, %arg1: memref<128x32xf32, #tpu.memory_space<vmem>>, %arg2: memref<128x1xi32, #tpu.memory_space<vmem>>, %arg3: memref<5x32x32xf32, #tpu.memory_space<vmem>>, %arg4: memref<5x1x32xf32, #tpu.memory_space<vmem>>, %arg5: memref<5x32x128xf32, #tpu.memory_space<vmem>>, %arg6: memref<5x1x128xf32, #tpu.memory_space<vmem>>, %arg7: memref<128x128xf32, #tpu.memory_space<vmem>>) attributes {dimension_semantics = [#tpu.dimension_semantics<arbitrary>], iteration_bounds = array<i64: 1>, scalar_prefetch = 0 : i64, scratch_operands = 0 : i64, tpu.core_type = #tpu.core_type<tc>, window_params = [{pipeline_mode = #tpu.pipeline_mode<synchronous>, transform_indices = @transform_0, window_bounds = array<i64: 128, 32>}, {pipeline_mode = #tpu.pipeline_mode<synchronous>, transform_indices = @transform_1, window_bounds = array<i64: 128, 1>}, {pipeline_mode = #tpu.pipeline_mode<synchronous>, transform_indices = @transform_2, window_bounds = array<i64: 5, 32, 32>}, {pipeline_mode = #tpu.pipeline_mode<synchronous>, transform_indices = @transform_3, window_bounds = array<i64: 5, 1, 32>}, {pipeline_mode = #tpu.pipeline_mode<synchronous>, transform_indices = @transform_4, window_bounds = array<i64: 5, 32, 128>}, {pipeline_mode = #tpu.pipeline_mode<synchronous>, transform_indices = @transform_5, window_bounds = array<i64: 5, 1, 128>}, {pipeline_mode = #tpu.pipeline_mode<synchronous>, transform_indices = @transform_6, window_bounds = array<i64: 128, 128>}]} {
    %c0 = arith.constant 0 : index
    %c0_0 = arith.constant 0 : index
    %0 = vector.load %arg1[%c0, %c0_0] : memref<128x32xf32, #tpu.memory_space<vmem>>, vector<128x32xf32>
    %c0_1 = arith.constant 0 : index
    %c0_2 = arith.constant 0 : index
    %1 = vector.load %arg2[%c0_1, %c0_2] : memref<128x1xi32, #tpu.memory_space<vmem>>, vector<128x1xi32>
    %cst = arith.constant 0.000000e+00 : f32
    %2 = vector.broadcast %cst : f32 to vector<128x128xf32>
    %c0_3 = arith.constant 0 : index
    %c0_4 = arith.constant 0 : index
    %c0_5 = arith.constant 0 : index
    %3 = vector.load %arg3[%c0_3, %c0_4, %c0_5] : memref<5x32x32xf32, #tpu.memory_space<vmem>>, vector<1x32x32xf32>
    %4 = vector.shape_cast %3 : vector<1x32x32xf32> to vector<32x32xf32>
    %cst_6 = arith.constant dense<0.000000e+00> : vector<128x32xf32>
    %5 = tpu.matmul %0, %4, %cst_6 {dimension_numbers = #tpu.dot_dimension_numbers<[1], [0], [0], [1], [0, 0, 1, 1], [], []>} : vector<128x32xf32>, vector<32x32xf32>, vector<128x32xf32> -> vector<128x32xf32>
    %c0_7 = arith.constant 0 : index
    %c0_8 = arith.constant 0 : index
    %c0_9 = arith.constant 0 : index
    %6 = vector.load %arg4[%c0_7, %c0_8, %c0_9] : memref<5x1x32xf32, #tpu.memory_space<vmem>>, vector<1x1x32xf32>
    %7 = vector.shape_cast %6 : vector<1x1x32xf32> to vector<1x32xf32>
    %8 = vector.broadcast %7 : vector<1x32xf32> to vector<128x32xf32>
    %9 = arith.addf %5, %8 : vector<128x32xf32>
    %10 = math.tanh %9 : vector<128x32xf32>
    %c0_10 = arith.constant 0 : index
    %c0_11 = arith.constant 0 : index
    %c0_12 = arith.constant 0 : index
    %11 = vector.load %arg5[%c0_10, %c0_11, %c0_12] : memref<5x32x128xf32, #tpu.memory_space<vmem>>, vector<1x32x128xf32>
    %12 = vector.shape_cast %11 : vector<1x32x128xf32> to vector<32x128xf32>
    %cst_13 = arith.constant dense<0.000000e+00> : vector<128x128xf32>
    %13 = tpu.matmul %10, %12, %cst_13 {dimension_numbers = #tpu.dot_dimension_numbers<[1], [0], [0], [1], [0, 0, 1, 1], [], []>} : vector<128x32xf32>, vector<32x128xf32>, vector<128x128xf32> -> vector<128x128xf32>
    %c0_14 = arith.constant 0 : index
    %c0_15 = arith.constant 0 : index
    %c0_16 = arith.constant 0 : index
    %14 = vector.load %arg6[%c0_14, %c0_15, %c0_16] : memref<5x1x128xf32, #tpu.memory_space<vmem>>, vector<1x1x128xf32>
    %15 = vector.shape_cast %14 : vector<1x1x128xf32> to vector<1x128xf32>
    %16 = vector.broadcast %15 : vector<1x128xf32> to vector<128x128xf32>
    %17 = arith.addf %13, %16 : vector<128x128xf32>
    %18 = math.tanh %17 : vector<128x128xf32>
    %c0_i32 = arith.constant 0 : i32
    %19 = vector.broadcast %c0_i32 : i32 to vector<128x1xi32>
    %20 = arith.cmpi eq, %1, %19 : vector<128x1xi32>
    %21 = vector.shape_cast %20 : vector<128x1xi1> to vector<128x1xi1>
    %22 = vector.broadcast %21 : vector<128x1xi1> to vector<128x128xi1>
    %23 = arith.select %22, %18, %2 : vector<128x128xi1>, vector<128x128xf32>
    %c1 = arith.constant 1 : index
    %c0_17 = arith.constant 0 : index
    %c0_18 = arith.constant 0 : index
    %24 = vector.load %arg3[%c1, %c0_17, %c0_18] : memref<5x32x32xf32, #tpu.memory_space<vmem>>, vector<1x32x32xf32>
    %25 = vector.shape_cast %24 : vector<1x32x32xf32> to vector<32x32xf32>
    %cst_19 = arith.constant dense<0.000000e+00> : vector<128x32xf32>
    %26 = tpu.matmul %0, %25, %cst_19 {dimension_numbers = #tpu.dot_dimension_numbers<[1], [0], [0], [1], [0, 0, 1, 1], [], []>} : vector<128x32xf32>, vector<32x32xf32>, vector<128x32xf32> -> vector<128x32xf32>
    %c1_20 = arith.constant 1 : index
    %c0_21 = arith.constant 0 : index
    %c0_22 = arith.constant 0 : index
    %27 = vector.load %arg4[%c1_20, %c0_21, %c0_22] : memref<5x1x32xf32, #tpu.memory_space<vmem>>, vector<1x1x32xf32>
    %28 = vector.shape_cast %27 : vector<1x1x32xf32> to vector<1x32xf32>
    %29 = vector.broadcast %28 : vector<1x32xf32> to vector<128x32xf32>
    %30 = arith.addf %26, %29 : vector<128x32xf32>
    %31 = math.tanh %30 : vector<128x32xf32>
    %c1_23 = arith.constant 1 : index
    %c0_24 = arith.constant 0 : index
    %c0_25 = arith.constant 0 : index
    %32 = vector.load %arg5[%c1_23, %c0_24, %c0_25] : memref<5x32x128xf32, #tpu.memory_space<vmem>>, vector<1x32x128xf32>
    %33 = vector.shape_cast %32 : vector<1x32x128xf32> to vector<32x128xf32>
    %cst_26 = arith.constant dense<0.000000e+00> : vector<128x128xf32>
    %34 = tpu.matmul %31, %33, %cst_26 {dimension_numbers = #tpu.dot_dimension_numbers<[1], [0], [0], [1], [0, 0, 1, 1], [], []>} : vector<128x32xf32>, vector<32x128xf32>, vector<128x128xf32> -> vector<128x128xf32>
    %c1_27 = arith.constant 1 : index
    %c0_28 = arith.constant 0 : index
    %c0_29 = arith.constant 0 : index
    %35 = vector.load %arg6[%c1_27, %c0_28, %c0_29] : memref<5x1x128xf32, #tpu.memory_space<vmem>>, vector<1x1x128xf32>
    %36 = vector.shape_cast %35 : vector<1x1x128xf32> to vector<1x128xf32>
    %37 = vector.broadcast %36 : vector<1x128xf32> to vector<128x128xf32>
    %38 = arith.addf %34, %37 : vector<128x128xf32>
    %39 = math.tanh %38 : vector<128x128xf32>
    %c1_i32 = arith.constant 1 : i32
    %40 = vector.broadcast %c1_i32 : i32 to vector<128x1xi32>
    %41 = arith.cmpi eq, %1, %40 : vector<128x1xi32>
    %42 = vector.shape_cast %41 : vector<128x1xi1> to vector<128x1xi1>
    %43 = vector.broadcast %42 : vector<128x1xi1> to vector<128x128xi1>
    %44 = arith.select %43, %39, %23 : vector<128x128xi1>, vector<128x128xf32>
    %c2 = arith.constant 2 : index
    %c0_30 = arith.constant 0 : index
    %c0_31 = arith.constant 0 : index
    %45 = vector.load %arg3[%c2, %c0_30, %c0_31] : memref<5x32x32xf32, #tpu.memory_space<vmem>>, vector<1x32x32xf32>
    %46 = vector.shape_cast %45 : vector<1x32x32xf32> to vector<32x32xf32>
    %cst_32 = arith.constant dense<0.000000e+00> : vector<128x32xf32>
    %47 = tpu.matmul %0, %46, %cst_32 {dimension_numbers = #tpu.dot_dimension_numbers<[1], [0], [0], [1], [0, 0, 1, 1], [], []>} : vector<128x32xf32>, vector<32x32xf32>, vector<128x32xf32> -> vector<128x32xf32>
    %c2_33 = arith.constant 2 : index
    %c0_34 = arith.constant 0 : index
    %c0_35 = arith.constant 0 : index
    %48 = vector.load %arg4[%c2_33, %c0_34, %c0_35] : memref<5x1x32xf32, #tpu.memory_space<vmem>>, vector<1x1x32xf32>
    %49 = vector.shape_cast %48 : vector<1x1x32xf32> to vector<1x32xf32>
    %50 = vector.broadcast %49 : vector<1x32xf32> to vector<128x32xf32>
    %51 = arith.addf %47, %50 : vector<128x32xf32>
    %52 = math.tanh %51 : vector<128x32xf32>
    %c2_36 = arith.constant 2 : index
    %c0_37 = arith.constant 0 : index
    %c0_38 = arith.constant 0 : index
    %53 = vector.load %arg5[%c2_36, %c0_37, %c0_38] : memref<5x32x128xf32, #tpu.memory_space<vmem>>, vector<1x32x128xf32>
    %54 = vector.shape_cast %53 : vector<1x32x128xf32> to vector<32x128xf32>
    %cst_39 = arith.constant dense<0.000000e+00> : vector<128x128xf32>
    %55 = tpu.matmul %52, %54, %cst_39 {dimension_numbers = #tpu.dot_dimension_numbers<[1], [0], [0], [1], [0, 0, 1, 1], [], []>} : vector<128x32xf32>, vector<32x128xf32>, vector<128x128xf32> -> vector<128x128xf32>
    %c2_40 = arith.constant 2 : index
    %c0_41 = arith.constant 0 : index
    %c0_42 = arith.constant 0 : index
    %56 = vector.load %arg6[%c2_40, %c0_41, %c0_42] : memref<5x1x128xf32, #tpu.memory_space<vmem>>, vector<1x1x128xf32>
    %57 = vector.shape_cast %56 : vector<1x1x128xf32> to vector<1x128xf32>
    %58 = vector.broadcast %57 : vector<1x128xf32> to vector<128x128xf32>
    %59 = arith.addf %55, %58 : vector<128x128xf32>
    %60 = math.tanh %59 : vector<128x128xf32>
    %c2_i32 = arith.constant 2 : i32
    %61 = vector.broadcast %c2_i32 : i32 to vector<128x1xi32>
    %62 = arith.cmpi eq, %1, %61 : vector<128x1xi32>
    %63 = vector.shape_cast %62 : vector<128x1xi1> to vector<128x1xi1>
    %64 = vector.broadcast %63 : vector<128x1xi1> to vector<128x128xi1>
    %65 = arith.select %64, %60, %44 : vector<128x128xi1>, vector<128x128xf32>
    %c3 = arith.constant 3 : index
    %c0_43 = arith.constant 0 : index
    %c0_44 = arith.constant 0 : index
    %66 = vector.load %arg3[%c3, %c0_43, %c0_44] : memref<5x32x32xf32, #tpu.memory_space<vmem>>, vector<1x32x32xf32>
    %67 = vector.shape_cast %66 : vector<1x32x32xf32> to vector<32x32xf32>
    %cst_45 = arith.constant dense<0.000000e+00> : vector<128x32xf32>
    %68 = tpu.matmul %0, %67, %cst_45 {dimension_numbers = #tpu.dot_dimension_numbers<[1], [0], [0], [1], [0, 0, 1, 1], [], []>} : vector<128x32xf32>, vector<32x32xf32>, vector<128x32xf32> -> vector<128x32xf32>
    %c3_46 = arith.constant 3 : index
    %c0_47 = arith.constant 0 : index
    %c0_48 = arith.constant 0 : index
    %69 = vector.load %arg4[%c3_46, %c0_47, %c0_48] : memref<5x1x32xf32, #tpu.memory_space<vmem>>, vector<1x1x32xf32>
    %70 = vector.shape_cast %69 : vector<1x1x32xf32> to vector<1x32xf32>
    %71 = vector.broadcast %70 : vector<1x32xf32> to vector<128x32xf32>
    %72 = arith.addf %68, %71 : vector<128x32xf32>
    %73 = math.tanh %72 : vector<128x32xf32>
    %c3_49 = arith.constant 3 : index
    %c0_50 = arith.constant 0 : index
    %c0_51 = arith.constant 0 : index
    %74 = vector.load %arg5[%c3_49, %c0_50, %c0_51] : memref<5x32x128xf32, #tpu.memory_space<vmem>>, vector<1x32x128xf32>
    %75 = vector.shape_cast %74 : vector<1x32x128xf32> to vector<32x128xf32>
    %cst_52 = arith.constant dense<0.000000e+00> : vector<128x128xf32>
    %76 = tpu.matmul %73, %75, %cst_52 {dimension_numbers = #tpu.dot_dimension_numbers<[1], [0], [0], [1], [0, 0, 1, 1], [], []>} : vector<128x32xf32>, vector<32x128xf32>, vector<128x128xf32> -> vector<128x128xf32>
    %c3_53 = arith.constant 3 : index
    %c0_54 = arith.constant 0 : index
    %c0_55 = arith.constant 0 : index
    %77 = vector.load %arg6[%c3_53, %c0_54, %c0_55] : memref<5x1x128xf32, #tpu.memory_space<vmem>>, vector<1x1x128xf32>
    %78 = vector.shape_cast %77 : vector<1x1x128xf32> to vector<1x128xf32>
    %79 = vector.broadcast %78 : vector<1x128xf32> to vector<128x128xf32>
    %80 = arith.addf %76, %79 : vector<128x128xf32>
    %81 = math.tanh %80 : vector<128x128xf32>
    %c3_i32 = arith.constant 3 : i32
    %82 = vector.broadcast %c3_i32 : i32 to vector<128x1xi32>
    %83 = arith.cmpi eq, %1, %82 : vector<128x1xi32>
    %84 = vector.shape_cast %83 : vector<128x1xi1> to vector<128x1xi1>
    %85 = vector.broadcast %84 : vector<128x1xi1> to vector<128x128xi1>
    %86 = arith.select %85, %81, %65 : vector<128x128xi1>, vector<128x128xf32>
    %c4 = arith.constant 4 : index
    %c0_56 = arith.constant 0 : index
    %c0_57 = arith.constant 0 : index
    %87 = vector.load %arg3[%c4, %c0_56, %c0_57] : memref<5x32x32xf32, #tpu.memory_space<vmem>>, vector<1x32x32xf32>
    %88 = vector.shape_cast %87 : vector<1x32x32xf32> to vector<32x32xf32>
    %cst_58 = arith.constant dense<0.000000e+00> : vector<128x32xf32>
    %89 = tpu.matmul %0, %88, %cst_58 {dimension_numbers = #tpu.dot_dimension_numbers<[1], [0], [0], [1], [0, 0, 1, 1], [], []>} : vector<128x32xf32>, vector<32x32xf32>, vector<128x32xf32> -> vector<128x32xf32>
    %c4_59 = arith.constant 4 : index
    %c0_60 = arith.constant 0 : index
    %c0_61 = arith.constant 0 : index
    %90 = vector.load %arg4[%c4_59, %c0_60, %c0_61] : memref<5x1x32xf32, #tpu.memory_space<vmem>>, vector<1x1x32xf32>
    %91 = vector.shape_cast %90 : vector<1x1x32xf32> to vector<1x32xf32>
    %92 = vector.broadcast %91 : vector<1x32xf32> to vector<128x32xf32>
    %93 = arith.addf %89, %92 : vector<128x32xf32>
    %94 = math.tanh %93 : vector<128x32xf32>
    %c4_62 = arith.constant 4 : index
    %c0_63 = arith.constant 0 : index
    %c0_64 = arith.constant 0 : index
    %95 = vector.load %arg5[%c4_62, %c0_63, %c0_64] : memref<5x32x128xf32, #tpu.memory_space<vmem>>, vector<1x32x128xf32>
    %96 = vector.shape_cast %95 : vector<1x32x128xf32> to vector<32x128xf32>
    %cst_65 = arith.constant dense<0.000000e+00> : vector<128x128xf32>
    %97 = tpu.matmul %94, %96, %cst_65 {dimension_numbers = #tpu.dot_dimension_numbers<[1], [0], [0], [1], [0, 0, 1, 1], [], []>} : vector<128x32xf32>, vector<32x128xf32>, vector<128x128xf32> -> vector<128x128xf32>
    %c4_66 = arith.constant 4 : index
    %c0_67 = arith.constant 0 : index
    %c0_68 = arith.constant 0 : index
    %98 = vector.load %arg6[%c4_66, %c0_67, %c0_68] : memref<5x1x128xf32, #tpu.memory_space<vmem>>, vector<1x1x128xf32>
    %99 = vector.shape_cast %98 : vector<1x1x128xf32> to vector<1x128xf32>
    %100 = vector.broadcast %99 : vector<1x128xf32> to vector<128x128xf32>
    %101 = arith.addf %97, %100 : vector<128x128xf32>
    %102 = math.tanh %101 : vector<128x128xf32>
    %c4_i32 = arith.constant 4 : i32
    %103 = vector.broadcast %c4_i32 : i32 to vector<128x1xi32>
    %104 = arith.cmpi eq, %1, %103 : vector<128x1xi32>
    %105 = vector.shape_cast %104 : vector<128x1xi1> to vector<128x1xi1>
    %106 = vector.broadcast %105 : vector<128x1xi1> to vector<128x128xi1>
    %107 = arith.select %106, %102, %86 : vector<128x128xi1>, vector<128x128xf32>
    %c0_69 = arith.constant 0 : index
    %c0_70 = arith.constant 0 : index
    %108 = vector.load %arg7[%c0_69, %c0_70] : memref<128x128xf32, #tpu.memory_space<vmem>>, vector<128x128xf32>
    tpu.vector_store %arg7[%c0_69, %c0_70], %107 {strides = array<i32>} : memref<128x128xf32, #tpu.memory_space<vmem>>, vector<128x128xf32>,
    return
  }
  func.func @transform_0(%arg0: i32) -> (i32, i32) {
    %c0_i32 = arith.constant 0 : i32
    %c0_i32_0 = arith.constant 0 : i32
    %c0_i32_1 = arith.constant 0 : i32
    return %c0_i32, %c0_i32_0 : i32, i32
  }
  func.func @transform_1(%arg0: i32) -> (i32, i32) {
    %c0_i32 = arith.constant 0 : i32
    %c0_i32_0 = arith.constant 0 : i32
    %c0_i32_1 = arith.constant 0 : i32
    return %c0_i32, %c0_i32_0 : i32, i32
  }
  func.func @transform_2(%arg0: i32) -> (i32, i32, i32) {
    %c0_i32 = arith.constant 0 : i32
    %c0_i32_0 = arith.constant 0 : i32
    %c0_i32_1 = arith.constant 0 : i32
    %c0_i32_2 = arith.constant 0 : i32
    return %c0_i32, %c0_i32_0, %c0_i32_1 : i32, i32, i32
  }
  func.func @transform_3(%arg0: i32) -> (i32, i32, i32) {
    %c0_i32 = arith.constant 0 : i32
    %c0_i32_0 = arith.constant 0 : i32
    %c0_i32_1 = arith.constant 0 : i32
    %c0_i32_2 = arith.constant 0 : i32
    return %c0_i32, %c0_i32_0, %c0_i32_1 : i32, i32, i32
  }
  func.func @transform_4(%arg0: i32) -> (i32, i32, i32) {
    %c0_i32 = arith.constant 0 : i32
    %c0_i32_0 = arith.constant 0 : i32
    %c0_i32_1 = arith.constant 0 : i32
    %c0_i32_2 = arith.constant 0 : i32
    return %c0_i32, %c0_i32_0, %c0_i32_1 : i32, i32, i32
  }
  func.func @transform_5(%arg0: i32) -> (i32, i32, i32) {
    %c0_i32 = arith.constant 0 : i32
    %c0_i32_0 = arith.constant 0 : i32
    %c0_i32_1 = arith.constant 0 : i32
    %c0_i32_2 = arith.constant 0 : i32
    return %c0_i32, %c0_i32_0, %c0_i32_1 : i32, i32, i32
  }
  func.func @transform_6(%arg0: i32) -> (i32, i32) {
    %c0_i32 = arith.constant 0 : i32
    %c0_i32_0 = arith.constant 0 : i32
    %c0_i32_1 = arith.constant 0 : i32
    return %c0_i32, %c0_i32_0 : i32, i32
  }
}

</mosaic_0001>

<bundles_post_ra>
// kernel: multi_head_policy_forward.1
= control target key start
LH: loop header
LB: loop body
LE: loop exit
PB: predicated region body
PF: predicated region fallthrough
CT: control target
= control target key end

     0   :  { %vm63_vm0 = vcmask 261120   ;;  %v2382_v21 = vmov 0   ;;  %s3617_s2 = inlined_call_operand.vmem [shape: f32[5,32,32], index: 2, kind: input, shape index: {}]   ;;  %s3618_s0 = inlined_call_operand.vmem [shape: f32[128,32], index: 0, kind: input, shape index: {}]   ;;  %s3619_s3 = inlined_call_operand.vmem [shape: f32[5,1,32], index: 3, kind: input, shape index: {}]   ;;  %s3620_s1 = inlined_call_operand.vmem [shape: s32[128,1], index: 1, kind: input, shape index: {}]   ;;  %s3621_s4 = inlined_call_operand.vmem [shape: f32[5,32,128], index: 4, kind: input, shape index: {}]   ;;  %s3622_s5 = inlined_call_operand.vmem [shape: f32[5,1,128], index: 5, kind: input, shape index: {}]   ;;  %s3623_s6 = inlined_call_operand.vmem [shape: f32[128,128], index: 6, kind: output, shape index: {}]  }
   0x1   :  { %v58_v0 = vld [vmem:[%s3617_s2 + $0x18] sm:$0xff]  ;;  %v57_v1 = vld [vmem:[%s3617_s2 + $0x10] sm:$0xff]  ;;  %v56_v2 = vld [vmem:[%s3617_s2 + $0x8] sm:$0xff]  ;;  %2040 = vset.pattern.permute.xlu1 %v2382_v21  ;;  %2039 = vset.pattern.permute.xlu0 %v2382_v21 }
   0x2   :  { %2030 = vmatpush.msra.mxu2 %v58_v0  ;;  %124 = vmatpush.msra.mxu0 %v58_v0  ;;  %v55_v3 = vld [vmem:[%s3617_s2] sm:$0xff]  ;;  %v1865_v6 = vld [vmem:[%s3617_s2 + $0x38] sm:$0xff]  ;;  %v1864_v8 = vld [vmem:[%s3617_s2 + $0x30] sm:$0xff] }
   0x3   :  { %v2433_v4 = vld [vmem:[%s3618_s0 + $0x40] sm:$0xff]  ;;  %v1907_v7 = vld [vmem:[%s3617_s2 + $0x58] sm:$0xff]  ;;  %v1906_v9 = vld [vmem:[%s3617_s2 + $0x50] sm:$0xff]  ;;  %2041 = vset.pattern.permute.xlu2 %v2382_v21 }
   0x4   :  { %2031 = vmatpush.msra.mxu2 %v57_v1  ;;  %125 = vmatpush.msra.mxu0 %v57_v1  ;;  %v2438_v5 = vld [vmem:[%s3618_s0] sm:$0xff]  ;;  %v1863_v10 = vld [vmem:[%s3617_s2 + $0x28] sm:$0xff]  ;;  %v2479_v14 = vld [vmem:[%s3618_s0 + $0x50] sm:$0xff] }
   0x5   :  { %v2462_v11 = vld [vmem:[%s3618_s0 + $0x48] sm:$0xff]  ;;  %v2484_v15 = vld [vmem:[%s3618_s0 + $0x10] sm:$0xff]  ;;  %v1862_v16 = vld [vmem:[%s3617_s2 + $0x20] sm:$0xff] }
   0x6   :  { %2032 = vmatpush.msra.mxu2 %v56_v2  ;;  %126 = vmatpush.msra.mxu0 %v56_v2  ;;  %v2467_v12 = vld [vmem:[%s3618_s0 + $0x8] sm:$0xff]  ;;  %v2496_v17 = vld [vmem:[%s3618_s0 + $0x58] sm:$0xff]  ;;  %v1904_v19 = vld [vmem:[%s3617_s2 + $0x40] sm:$0xff] }
   0x7   :  { %v1905_v13 = vld [vmem:[%s3617_s2 + $0x48] sm:$0xff]  ;;  %v2501_v18 = vld [vmem:[%s3618_s0 + $0x18] sm:$0xff]  ;;  %v2513_v20 = vld [vmem:[%s3620_s1 + $0x10] sm:$0xff] }
   0x8   :  { %2033 = vmatpush.msra.mxu2 %v55_v3  ;;  %127 = vmatpush.msra.mxu0 %v55_v3  ;;  %vm332_vm1 = vcmp.eq.s32.totalorder %v2513_v20, 0  ;;  %v2520_v22 = vld [vmem:[%s3620_s1] sm:$0xff]  ;;  %v1949_v27 = vld [vmem:[%s3617_s2 + $0x78] sm:$0xff]  ;;  %v2553_v29 = vld [vmem:[%s3620_s1 + $0x8] sm:$0xff]  ;;  %vm674_vm15 = vcmp.eq.s32.totalorder %v2513_v20, 1 }
   0x9   :  { %1838 = vmatmul.msk.f32.vlgmr.msra.gmra.mxu2 %vm63_vm0, %v2433_v4  ;;  %1830 = vmatmul.msk.f32.vlgmr.msra.gmra.mxu0 %vm63_vm0, %v2438_v5  ;;  %v348_v23 = vsel %vm332_vm1, 1, %v2382_v21  ;;  %vm330_vm2 = vcmp.eq.s32.totalorder %v2520_v22, 0  ;;  %v2530_v25 = vld [vmem:[%s3618_s0 + $0x60] sm:$0xff]  ;;  %v2547_v28 = vld [vmem:[%s3620_s1 + $0x18] sm:$0xff]  ;;  %vm331_vm4 = vcmp.eq.s32.totalorder %v2553_v29, 0  ;;  %v2561_v32 = vld [vmem:[%s3618_s0 + $0x68] sm:$0xff] }
   0xa   :  { %464 = vmatpush.msrb.mxu2 %v1865_v6  ;;  %806 = vmatpush.msrb.mxu0 %v1907_v7  ;;  %v346_v24 = vsel %vm330_vm2, 1, %v2382_v21  ;;  %v2535_v26 = vld [vmem:[%s3618_s0 + $0x20] sm:$0xff]  ;;  %vm333_vm3 = vcmp.eq.s32.totalorder %v2547_v28, 0  ;;  %v347_v31 = vsel %vm331_vm4, 1, %v2382_v21  ;;  %v2566_v33 = vld [vmem:[%s3618_s0 + $0x28] sm:$0xff]  ;;  %v1991_v34 = vld [vmem:[%s3617_s2 + $0x98] sm:$0xff] }
   0xb   :  { %369 = vperm.xlu1 %2040, %v348_v23   ;;  %363 = vperm.xlu0 %2039, %v346_v24   ;;  %v349_v30 = vsel %vm333_vm3, 1, %v2382_v21  ;;  %v2578_v35 = vld [vmem:[%s3620_s1 + $0x38] sm:$0xff]  ;;  %v2583_v36 = vld [vmem:[%s3620_s1 + $0x30] sm:$0xff]  ;;  %v2611_v42 = vld [vmem:[%s3620_s1 + $0x48] sm:$0xff]  ;;  %vm672_vm11 = vcmp.eq.s32.totalorder %v2520_v22, 1  ;;  %vm675_vm14 = vcmp.eq.s32.totalorder %v2547_v28, 1 }
   0xc   :  { %465 = vmatpush.msrb.mxu2 %v1864_v8  ;;  %807 = vmatpush.msrb.mxu0 %v1906_v9  ;;  %vm337_vm5 = vcmp.eq.s32.totalorder %v2578_v35, 0  ;;  %vm336_vm6 = vcmp.eq.s32.totalorder %v2583_v36, 0  ;;  %v2592_v39 = vld [vmem:[%s3618_s0 + $0x70] sm:$0xff]  ;;  %vm339_vm8 = vcmp.eq.s32.totalorder %v2611_v42, 0  ;;  %v2620_v45 = vld [vmem:[%s3618_s0 + $0x78] sm:$0xff]  ;;  %v2634_v47 = vld [vmem:[%s3620_s1 + $0x68] sm:$0xff] }
   0xd   :  { %v353_v37 = vsel %vm337_vm5, 1, %v2382_v21  ;;  %v352_v38 = vsel %vm336_vm6, 1, %v2382_v21  ;;  %v2597_v40 = vld [vmem:[%s3618_s0 + $0x30] sm:$0xff]  ;;  %v355_v44 = vsel %vm339_vm8, 1, %v2382_v21  ;;  %v2625_v46 = vld [vmem:[%s3618_s0 + $0x38] sm:$0xff]  ;;  %v2639_v48 = vld [vmem:[%s3620_s1 + $0x60] sm:$0xff] }
   0xe   :  { %466 = vmatpush.msrb.mxu2 %v1863_v10  ;;  %808 = vmatpush.msrb.mxu0 %v1905_v13  ;;  %v2606_v41 = vld [vmem:[%s3620_s1 + $0x50] sm:$0xff]  ;;  %vm343_vm9 = vcmp.eq.s32.totalorder %v2634_v47, 0  ;;  %vm342_vm10 = vcmp.eq.s32.totalorder %v2639_v48, 0  ;;  %v2655_v52 = vld [vmem:[%s3620_s1 + $0x20] sm:$0xff]  ;;  %v2661_v53 = vld [vmem:[%s3620_s1 + $0x78] sm:$0xff]  ;;  %v688_v54 = vsel %vm672_vm11, 1, %v2382_v21 }
   0xf   :  { %vm340_vm7 = vcmp.eq.s32.totalorder %v2606_v41, 0  ;;  %v359_v49 = vsel %vm343_vm9, 1, %v2382_v21  ;;  %v358_v50 = vsel %vm342_vm10, 1, %v2382_v21  ;;  %v1948_v51 = vld [vmem:[%s3617_s2 + $0x70] sm:$0xff]  ;;  %vm334_vm12 = vcmp.eq.s32.totalorder %v2655_v52, 0  ;;  %v2678_v58 = vld [vmem:[%s3620_s1 + $0x28] sm:$0xff] }
  0x10   :  { %467 = vmatpush.msrb.mxu2 %v1862_v16  ;;  %809 = vmatpush.msrb.mxu0 %v1904_v19  ;;  %v356_v43 = vsel %vm340_vm7, 1, %v2382_v21  ;;  %vm345_vm13 = vcmp.eq.s32.totalorder %v2661_v53, 0  ;;  %v350_v55 = vsel %vm334_vm12, 1, %v2382_v21  ;;  %v1990_v57 = vld [vmem:[%s3617_s2 + $0x90] sm:$0xff]  ;;  %vm335_vm1 = vcmp.eq.s32.totalorder %v2678_v58, 0  ;;  %v2693_v62 = vld [vmem:[%s3620_s1 + $0x40] sm:$0xff] }
  0x11   :  { %1839 = vmatmul.msk.f32.gmra.mxu2 %vm63_vm0, %v2462_v11  ;;  %1831 = vmatmul.msk.f32.gmra.mxu0 %vm63_vm0, %v2467_v12  ;;  %v361_v56 = vsel %vm345_vm13, 1, %v2382_v21  ;;  %v691_v59 = vsel %vm675_vm14, 1, %v2382_v21  ;;  %v690_v60 = vsel %vm674_vm15, 1, %v2382_v21  ;;  %v351_v61 = vsel %vm335_vm1, 1, %v2382_v21  ;;  %v2708_v2 = vld [vmem:[%s3620_s1 + $0x58] sm:$0xff]  ;;  %v1947_v8 = vld [vmem:[%s3617_s2 + $0x68] sm:$0xff] }
  0x12   :  { %1148 = vmatpush.msra.mxu2 %v1949_v27  ;;  %1490 = vmatpush.msra.mxu0 %v1991_v34  ;;  %vm678_vm2 = vcmp.eq.s32.totalorder %v2583_v36, 1  ;;  %vm677_vm3 = vcmp.eq.s32.totalorder %v2678_v58, 1  ;;  %vm338_vm4 = vcmp.eq.s32.totalorder %v2693_v62, 0  ;;  %vm681_vm5 = vcmp.eq.s32.totalorder %v2611_v42, 1  ;;  %v2726_v9 = vld [vmem:[%s3620_s1 + $0x70] sm:$0xff]  ;;  %v196_v10 = vld [vmem:[%s3621_s4 + $0x18] sm:$0xff] }
  0x13   :  { %372 = vperm.xlu1 %2040, %v349_v30   ;;  %366 = vperm.xlu0 %2039, %v347_v31   ;;  %v694_v63 = vsel %vm678_vm2, 1, %v2382_v21  ;;  %v693_v0 = vsel %vm677_vm3, 1, %v2382_v21  ;;  %v354_v1 = vsel %vm338_vm4, 1, %v2382_v21  ;;  %vm680_vm6 = vcmp.eq.s32.totalorder %v2693_v62, 1  ;;  %v195_v23 = vld [vmem:[%s3621_s4 + $0x10] sm:$0xff]  ;;  %v194_v24 = vld [vmem:[%s3621_s4 + $0x8] sm:$0xff] }
  0x14   :  { %1149 = vmatpush.msra.mxu2 %v1948_v51  ;;  %375 = vperm.xlu2 %2041, %v350_v55   ;;  %vm341_vm7 = vcmp.eq.s32.totalorder %v2708_v2, 0  ;;  %v697_v3 = vsel %vm681_vm5, 1, %v2382_v21  ;;  %v696_v6 = vsel %vm680_vm6, 1, %v2382_v21  ;;  %vm344_vm8 = vcmp.eq.s32.totalorder %v2726_v9, 0  ;;  %v193_v27 = vld [vmem:[%s3621_s4] sm:$0xff]  ;;  %v1886_v30 = vld [vmem:[%s3621_s4 + $0x38] sm:$0xff] }
  0x15   :  { %1491 = vmatpush.msra.mxu0 %v1990_v57  ;;  %v357_v7 = vsel %vm341_vm7, 1, %v2382_v21  ;;  %vm684_vm9 = vcmp.eq.s32.totalorder %v2639_v48, 1  ;;  %vm683_vm10 = vcmp.eq.s32.totalorder %v2708_v2, 1  ;;  %2034 = vmatpush.msra.mxu3 %v196_v10  ;;  %v360_v13 = vsel %vm344_vm8, 1, %v2382_v21  ;;  %v1989_v31 = vld [vmem:[%s3617_s2 + $0x88] sm:$0xff] }
  0x16   :  { %1150 = vmatpush.msra.mxu2 %v1947_v8  ;;  %v700_v16 = vsel %vm684_vm9, 1, %v2382_v21  ;;  %v699_v19 = vsel %vm683_vm10, 1, %v2382_v21  ;;  %261 = vmatpush.msra.mxu1 %v196_v10  ;;  %vm673_vm11 = vcmp.eq.s32.totalorder %v2553_v29, 1  ;;  %vm687_vm12 = vcmp.eq.s32.totalorder %v2661_v53, 1  ;;  %v2782_v51 = vld [vmem:[%s3619_s3] ss:$0 sm:$0xff] }
  0x17   :  { %2035 = vmatpush.msra.mxu3 %v195_v23  ;;  %vm686_vm13 = vcmp.eq.s32.totalorder %v2726_v9, 1  ;;  %v689_v34 = vsel %vm673_vm11, 1, %v2382_v21  ;;  %1492 = vmatpush.msra.mxu0 %v1989_v31  ;;  %vm676_vm14 = vcmp.eq.s32.totalorder %v2655_v52, 1  ;;  %vm1016_vm15 = vcmp.eq.s32.totalorder %v2513_v20, 2 }
  0x18   :  { %262 = vmatpush.msra.mxu1 %v195_v23  ;;  %vm1015_vm1 = vcmp.eq.s32.totalorder %v2553_v29, 2  ;;  %vm679_vm2 = vcmp.eq.s32.totalorder %v2578_v35, 1  ;;  %vm1019_vm3 = vcmp.eq.s32.totalorder %v2678_v58, 2  ;;  %vm1018_vm4 = vcmp.eq.s32.totalorder %v2655_v52, 2 }
  0x19   :  { %1840 = vmatmul.msk.f32.gmra.mxu2 %vm63_vm0, %v2479_v14  ;;  %1832 = vmatmul.msk.f32.gmra.mxu0 %vm63_vm0, %v2484_v15  ;;  %v695_v57 = vsel %vm679_vm2, 1, %v2382_v21  ;;  %vm682_vm5 = vcmp.eq.s32.totalorder %v2606_v41, 1  ;;  %vm1022_vm6 = vcmp.eq.s32.totalorder %v2693_v62, 2  ;;  %vm1021_vm7 = vcmp.eq.s32.totalorder %v2578_v35, 2 }
  0x1a   :  { %2036 = vmatpush.msra.mxu3 %v194_v24  ;;  %263 = vmatpush.msra.mxu1 %v194_v24  ;;  %v1038_v8 = vsel %vm1022_vm6, 1, %v2382_v21  ;;  %v1037_v10 = vsel %vm1021_vm7, 1, %v2382_v21  ;;  %vm685_vm8 = vcmp.eq.s32.totalorder %v2634_v47, 1  ;;  %vm1025_vm9 = vcmp.eq.s32.totalorder %v2708_v2, 2 }
  0x1b   :  { %384 = vperm.xlu1 %2040, %v353_v37   ;;  %381 = vperm.xlu0 %2039, %v352_v38   ;;  %v703_v37 = vsel %vm687_vm12, 1, %v2382_v21  ;;  %v702_v38 = vsel %vm686_vm13, 1, %v2382_v21  ;;  %vm1024_vm10 = vcmp.eq.s32.totalorder %v2606_v41, 2  ;;  %v701_v31 = vsel %vm685_vm8, 1, %v2382_v21 }
  0x1c   :  { %378 = vperm.xlu2 %2041, %v351_v61   ;;  %2037 = vmatpush.msra.mxu3 %v193_v27  ;;  %v1946_v61 = vld [vmem:[%s3617_s2 + $0x60] sm:$0xff]  ;;  %vm1014_vm11 = vcmp.eq.s32.totalorder %v2520_v22, 2  ;;  %vm1028_vm12 = vcmp.eq.s32.totalorder %v2726_v9, 2  ;;  %vm1027_vm13 = vcmp.eq.s32.totalorder %v2634_v47, 2  ;;  %vm1020_vm2 = vcmp.eq.s32.totalorder %v2583_v36, 2 }
  0x1d   :  { %264 = vmatpush.msra.mxu1 %v193_v27  ;;  %1151 = vmatpush.msra.mxu2 %v1946_v61  ;;  %v1884_v27 = vld [vmem:[%s3621_s4 + $0x28] sm:$0xff]  ;;  %vm1363_vm6 = vcmp.eq.s32.totalorder %v2578_v35, 3  ;;  %vm1362_vm7 = vcmp.eq.s32.totalorder %v2583_v36, 3  ;;  %vm1026_vm8 = vcmp.eq.s32.totalorder %v2639_v48, 2 }
  0x1e   :  { %603 = vmatpush.msrb.mxu3 %v1886_v30  ;;  %v1988_v30 = vld [vmem:[%s3617_s2 + $0x80] sm:$0xff] }
  0x1f   :  { %1493 = vmatpush.msra.mxu0 %v1988_v30 }
  0x21   :  { %1841 = vmatmul.msk.f32.gmra.mxu2 %vm63_vm0, %v2496_v17  ;;  %1833 = vmatmul.msk.f32.gmra.mxu0 %vm63_vm0, %v2501_v18 }
  0x23   :  { %393 = vperm.xlu1 %2040, %v356_v43   ;;  %390 = vperm.xlu0 %2039, %v355_v44   ;;  %v1928_v43 = vld [vmem:[%s3621_s4 + $0x58] sm:$0xff]  ;;  %v692_v44 = vsel %vm676_vm14, 1, %v2382_v21  ;;  %vm1017_vm14 = vcmp.eq.s32.totalorder %v2547_v28, 2 }
  0x24   :  { %387 = vperm.xlu2 %2041, %v354_v1   ;;  %945 = vmatpush.msrb.mxu1 %v1928_v43 }
  0x29   :  { %1842 = vmatmul.msk.f32.gmra.mxu2 %vm63_vm0, %v2530_v25  ;;  %1834 = vmatmul.msk.f32.gmra.mxu0 %vm63_vm0, %v2535_v26 }
  0x2b   :  { %402 = vperm.xlu1 %2040, %v359_v49   ;;  %399 = vperm.xlu0 %2039, %v358_v50   ;;  %v1032_v49 = vsel %vm1016_vm15, 1, %v2382_v21  ;;  %v1031_v50 = vsel %vm1015_vm1, 1, %v2382_v21  ;;  %vm1357_vm15 = vcmp.eq.s32.totalorder %v2553_v29, 3  ;;  %vm1356_vm1 = vcmp.eq.s32.totalorder %v2520_v22, 3 }
  0x2c   :  { %396 = vperm.xlu2 %2041, %v357_v7   ;;  %v698_v7 = vsel %vm682_vm5, 1, %v2382_v21  ;;  %vm1023_vm5 = vcmp.eq.s32.totalorder %v2611_v42, 2 }
  0x31   :  { %1843 = vmatmul.msk.f32.gmra.mxu2 %vm63_vm0, %v2561_v32  ;;  %1835 = vmatmul.msk.f32.gmra.mxu0 %vm63_vm0, %v2566_v33 }
  0x33   :  { %705 = vperm.xlu1 %2040, %v688_v54   ;;  %408 = vperm.xlu0 %2039, %v361_v56   ;;  %v1885_v56 = vld [vmem:[%s3621_s4 + $0x30] sm:$0xff] }
  0x34   :  { %405 = vperm.xlu2 %2041, %v360_v13   ;;  %604 = vmatpush.msrb.mxu3 %v1885_v56  ;;  %v1044_v56 = vsel %vm1028_vm12, 1, %v2382_v21  ;;  %vm1369_vm12 = vcmp.eq.s32.totalorder %v2634_v47, 3  ;;  %v2942_v47 = vld [vmem:[%s3619_s3 + $0x1] ss:$0 sm:$0xff] }
  0x36   :  { %605 = vmatpush.msrb.mxu3 %v1884_v27 }
  0x39   :  { %1844 = vmatmul.msk.f32.gmra.mxu2 %vm63_vm0, %v2592_v39  ;;  %1836 = vmatmul.msk.f32.gmra.mxu0 %vm63_vm0, %v2597_v40 }
  0x3b   :  { %714 = vperm.xlu1 %2040, %v691_v59   ;;  %711 = vperm.xlu0 %2039, %v690_v60   ;;  %v1035_v59 = vsel %vm1019_vm3, 1, %v2382_v21  ;;  %v1034_v60 = vsel %vm1018_vm4, 1, %v2382_v21  ;;  %vm1360_vm3 = vcmp.eq.s32.totalorder %v2655_v52, 3  ;;  %vm1359_vm4 = vcmp.eq.s32.totalorder %v2547_v28, 3 }
  0x3c   :  { %708 = vperm.xlu2 %2041, %v689_v34   ;;  %v1041_v34 = vsel %vm1025_vm9, 1, %v2382_v21  ;;  %vm1366_vm9 = vcmp.eq.s32.totalorder %v2606_v41, 3  ;;  %v2925_v41 = vld [vmem:[%s3619_s3 + $0x2] ss:$0 sm:$0xff] }
  0x41   :  { %1845 = vmatmul.msk.f32.gmra.mxu2 %vm63_vm0, %v2620_v45  ;;  %1837 = vmatmul.msk.f32.gmra.mxu0 %vm63_vm0, %v2625_v46 }
  0x43   :  { %723 = vperm.xlu1 %2040, %v694_v63   ;;  %720 = vperm.xlu0 %2039, %v693_v0  }
  0x44   :  { %717 = vperm.xlu2 %2041, %v692_v44  }
  0x49   :  { %1867 = vmatmul.msk.f32.vlgmr.msrb.gmra.mxu2 %vm63_vm0, %v2438_v5  ;;  %1909 = vmatmul.msk.f32.vlgmr.msrb.gmra.mxu0 %vm63_vm0, %v2438_v5 }
  0x4b   :  { %732 = vperm.xlu1 %2040, %v697_v3   ;;  %729 = vperm.xlu0 %2039, %v696_v6   ;;  %v1927_v6 = vld [vmem:[%s3621_s4 + $0x50] sm:$0xff] }
  0x4c   :  { %726 = vperm.xlu2 %2041, %v695_v57   ;;  %946 = vmatpush.msrb.mxu1 %v1927_v6  ;;  %v1043_v57 = vsel %vm1027_vm13, 1, %v2382_v21  ;;  %v1372_v6 = vsel %vm1356_vm1, 1, %v2382_v21  ;;  %vm1368_vm13 = vcmp.eq.s32.totalorder %v2639_v48, 3  ;;  %vm1371_vm1 = vcmp.eq.s32.totalorder %v2661_v53, 3 }
  0x51   :  { %1868 = vmatmul.msk.f32.gmra.mxu2 %vm63_vm0, %v2467_v12  ;;  %1910 = vmatmul.msk.f32.gmra.mxu0 %vm63_vm0, %v2467_v12 }
  0x53   :  { %741 = vperm.xlu1 %2040, %v700_v16   ;;  %738 = vperm.xlu0 %2039, %v699_v19  }
  0x54   :  { %735 = vperm.xlu2 %2041, %v698_v7  }
  0x59   :  { %1869 = vmatmul.msk.f32.gmra.mxu2 %vm63_vm0, %v2484_v15  ;;  %1911 = vmatmul.msk.f32.gmra.mxu0 %vm63_vm0, %v2484_v15 }
  0x5b   :  { %750 = vperm.xlu1 %2040, %v703_v37   ;;  %747 = vperm.xlu0 %2039, %v702_v38   ;;  %v1040_v37 = vsel %vm1024_vm10, 1, %v2382_v21  ;;  %vm1365_vm10 = vcmp.eq.s32.totalorder %v2611_v42, 3 }
  0x5c   :  { %744 = vperm.xlu2 %2041, %v701_v31  }
  0x61   :  { %1870 = vmatmul.msk.f32.gmra.mxu2 %vm63_vm0, %v2501_v18  ;;  %1912 = vmatmul.msk.f32.gmra.mxu0 %vm63_vm0, %v2501_v18 }
  0x63   :  { %1053 = vperm.xlu1 %2040, %v1032_v49   ;;  %1050 = vperm.xlu0 %2039, %v1031_v50  }
  0x69   :  { %1871 = vmatmul.msk.f32.gmra.mxu2 %vm63_vm0, %v2535_v26  ;;  %1913 = vmatmul.msk.f32.gmra.mxu0 %vm63_vm0, %v2535_v26 }
  0x6b   :  { %1062 = vperm.xlu1 %2040, %v1035_v59   ;;  %1059 = vperm.xlu0 %2039, %v1034_v60  }
  0x71   :  { %1872 = vmatmul.msk.f32.gmra.mxu2 %vm63_vm0, %v2566_v33  ;;  %1914 = vmatmul.msk.f32.gmra.mxu0 %vm63_vm0, %v2566_v33 }
  0x73   :  { %1071 = vperm.xlu1 %2040, %v1038_v8   ;;  %1068 = vperm.xlu0 %2039, %v1037_v10  }
  0x79   :  { %1873 = vmatmul.msk.f32.gmra.mxu2 %vm63_vm0, %v2597_v40  ;;  %1915 = vmatmul.msk.f32.gmra.mxu0 %vm63_vm0, %v2597_v40 }
  0x7b   :  { %1080 = vperm.xlu1 %2040, %v1041_v34   ;;  %1077 = vperm.xlu0 %2039, %v1040_v37  }
  0x81   :  { %1874 = vmatmul.msk.f32.gmra.mxu2 %vm63_vm0, %v2625_v46  ;;  %1916 = vmatmul.msk.f32.gmra.mxu0 %vm63_vm0, %v2625_v46 }
  0x83   :  { %1089 = vperm.xlu1 %2040, %v1044_v56   ;;  %1086 = vperm.xlu0 %2039, %v1043_v57   ;;  %v2012_v57 = vld [vmem:[%s3621_s4 + $0x98] sm:$0xff] }
  0x86   :  { %v129_v54 = vpop.f32.mrf.mxu0 }
  0x87   :  { %v130_v55 = vadd.f32 %v2782_v51, %v129_v54  ;;  %v1926_v54 = vld [vmem:[%s3621_s4 + $0x48] sm:$0xff] }
  0x88   :  { %947 = vmatpush.msrb.mxu1 %v1926_v54 }
  0x89   :  { %1875 = vmatmul.msk.f32.gmra.mxu2 %vm63_vm0, %v2433_v4  ;;  %2052 = vtanh.f32 %v130_v55  ;;  %1917 = vmatmul.msk.f32.gmra.mxu0 %vm63_vm0, %v2433_v4  ;;  %v1030_v55 = vsel %vm1014_vm11, 1, %v2382_v21  ;;  %vm1029_vm11 = vcmp.eq.s32.totalorder %v2661_v53, 2 }
  0x8a   :  { %1047 = vperm.xlu2 %2041, %v1030_v55  }
  0x8b   :  { %1389 = vperm.xlu0 %2039, %v1372_v6   ;;  %v1385_v6 = vsel %vm1369_vm12, 1, %v2382_v21  ;;  %vm1710_vm12 = vcmp.eq.s32.totalorder %v2639_v48, 4 }
  0x8c   :  { %v153_v63 = vpop.f32.mrf.mxu2 }
  0x8d   :  { %v154_v0 = vadd.f32 %v2782_v51, %v153_v63 }
  0x8e   :  { %v132_v1 = vpop.f32.mrf.mxu0 }
  0x8f   :  { %v2053_v3 = vpop.eup %2052  ;;  %2054 = vtanh.f32 %v154_v0  ;;  %v133_v4 = vadd.f32 %v2782_v51, %v132_v1  ;;  %v1883_v1 = vld [vmem:[%s3621_s4 + $0x20] sm:$0xff] }
  0x90   :  { %1846 = vmatmul.msk.f32.vlgmr.msra.gmra.mxu1 %vm63_vm0, %v2053_v3  ;;  %v1033_v3 = vsel %vm1017_vm14, 1, %v2382_v21  ;;  %606 = vmatpush.msrb.mxu3 %v1883_v1  ;;  %vm1358_vm14 = vcmp.eq.s32.totalorder %v2513_v20, 3 }
  0x91   :  { %1876 = vmatmul.msk.f32.gmra.mxu2 %vm63_vm0, %v2462_v11  ;;  %2056 = vtanh.f32 %v133_v4  ;;  %1918 = vmatmul.msk.f32.gmra.mxu0 %vm63_vm0, %v2462_v11  ;;  %v1373_v4 = vsel %vm1357_vm15, 1, %v2382_v21  ;;  %vm1698_vm15 = vcmp.eq.s32.totalorder %v2520_v22, 4 }
  0x92   :  { %1056 = vperm.xlu2 %2041, %v1033_v3   ;;  %1392 = vperm.xlu1 %2040, %v1373_v4   ;;  %v1045_v4 = vsel %vm1029_vm11, 1, %v2382_v21  ;;  %vm1370_vm11 = vcmp.eq.s32.totalorder %v2726_v9, 3 }
  0x94   :  { %v156_v13 = vpop.f32.mrf.mxu2 }
  0x95   :  { %v2055_v16 = vpop.eup %2054  ;;  %v157_v19 = vadd.f32 %v2782_v51, %v156_v13 }
  0x96   :  { %1854 = vmatmul.msk.f32.vlgmr.msra.gmra.mxu3 %vm63_vm0, %v2055_v16  ;;  %v135_v23 = vpop.f32.mrf.mxu0 }
  0x97   :  { %v2057_v24 = vpop.eup %2056  ;;  %2058 = vtanh.f32 %v157_v19  ;;  %v136_v11 = vadd.f32 %v2782_v51, %v135_v23  ;;  %v1925_v19 = vld [vmem:[%s3621_s4 + $0x40] sm:$0xff]  ;;  %v1036_v23 = vsel %vm1020_vm2, 1, %v2382_v21  ;;  %vm1361_vm2 = vcmp.eq.s32.totalorder %v2678_v58, 3 }
  0x98   :  { %1847 = vmatmul.msk.f32.gmra.mxu1 %vm63_vm0, %v2057_v24  ;;  %v1376_v24 = vsel %vm1360_vm3, 1, %v2382_v21  ;;  %vm1701_vm3 = vcmp.eq.s32.totalorder %v2547_v28, 4 }
  0x99   :  { %1877 = vmatmul.msk.f32.gmra.mxu2 %vm63_vm0, %v2479_v14  ;;  %2060 = vtanh.f32 %v136_v11  ;;  %1919 = vmatmul.msk.f32.gmra.mxu0 %vm63_vm0, %v2479_v14  ;;  %v1375_v11 = vsel %vm1359_vm4, 1, %v2382_v21  ;;  %vm1700_vm4 = vcmp.eq.s32.totalorder %v2513_v20, 4 }
  0x9a   :  { %948 = vmatpush.msrb.mxu1 %v1925_v19  ;;  %1065 = vperm.xlu2 %2041, %v1036_v23   ;;  %v1714_v19 = vsel %vm1698_vm15, 1, %v2382_v21  ;;  %v1387_v23 = vsel %vm1371_vm1, 1, %v2382_v21  ;;  %vm1713_vm15 = vcmp.eq.s32.totalorder %v2661_v53, 4  ;;  %vm1712_vm1 = vcmp.eq.s32.totalorder %v2726_v9, 4  ;;  %v3039_v53 = vpop.permute.xlu0 %363 }
  0x9b   :  { %1401 = vperm.xlu1 %2040, %v1376_v24   ;;  %1398 = vperm.xlu0 %2039, %v1375_v11  }
  0x9c   :  { %v159_v38 = vpop.f32.mrf.mxu2  ;;  %1629 = vmatpush.msra.mxu1 %v2012_v57 }
  0x9d   :  { %v2059_v43 = vpop.eup %2058  ;;  %v160_v44 = vadd.f32 %v2782_v51, %v159_v38  ;;  %v1970_v38 = vld [vmem:[%s3621_s4 + $0x78] sm:$0xff] }
  0x9e   :  { %1855 = vmatmul.msk.f32.gmra.mxu3 %vm63_vm0, %v2059_v43  ;;  %v138_v49 = vpop.f32.mrf.mxu0  ;;  %v1039_v43 = vsel %vm1023_vm5, 1, %v2382_v21  ;;  %vm1364_vm5 = vcmp.eq.s32.totalorder %v2693_v62, 3 }
  0x9f   :  { %v2061_v50 = vpop.eup %2060  ;;  %2062 = vtanh.f32 %v160_v44  ;;  %v139_v14 = vadd.f32 %v2782_v51, %v138_v49  ;;  %1287 = vmatpush.msra.mxu3 %v1970_v38  ;;  %v1379_v44 = vsel %vm1363_vm6, 1, %v2382_v21  ;;  %v1378_v49 = vsel %vm1362_vm7, 1, %v2382_v21 }
  0xa0   :  { %1848 = vmatmul.msk.f32.gmra.mxu1 %vm63_vm0, %v2061_v50  ;;  %vm1704_vm6 = vcmp.eq.s32.totalorder %v2583_v36, 4  ;;  %vm1703_vm7 = vcmp.eq.s32.totalorder %v2678_v58, 4 }
  0xa1   :  { %1878 = vmatmul.msk.f32.gmra.mxu2 %vm63_vm0, %v2496_v17  ;;  %2064 = vtanh.f32 %v139_v14  ;;  %1920 = vmatmul.msk.f32.gmra.mxu0 %vm63_vm0, %v2496_v17 }
  0xa2   :  { %1074 = vperm.xlu2 %2041, %v1039_v43  }
  0xa3   :  { %1410 = vperm.xlu1 %2040, %v1379_v44   ;;  %1407 = vperm.xlu0 %2039, %v1378_v49   ;;  %v2011_v49 = vld [vmem:[%s3621_s4 + $0x90] sm:$0xff] }
  0xa4   :  { %v162_v59 = vpop.f32.mrf.mxu2  ;;  %1630 = vmatpush.msra.mxu1 %v2011_v49 }
  0xa5   :  { %v2063_v60 = vpop.eup %2062  ;;  %v163_v61 = vadd.f32 %v2782_v51, %v162_v59  ;;  %v1042_v59 = vsel %vm1026_vm8, 1, %v2382_v21  ;;  %vm1367_vm8 = vcmp.eq.s32.totalorder %v2708_v2, 3 }
  0xa6   :  { %1856 = vmatmul.msk.f32.gmra.mxu3 %vm63_vm0, %v2063_v60  ;;  %v141_v63 = vpop.f32.mrf.mxu0  ;;  %v1382_v60 = vsel %vm1366_vm9, 1, %v2382_v21  ;;  %vm1707_vm9 = vcmp.eq.s32.totalorder %v2611_v42, 4  ;;  %v1383_v57 = vsel %vm1367_vm8, 1, %v2382_v21 }
  0xa7   :  { %v2065_v0 = vpop.eup %2064  ;;  %2066 = vtanh.f32 %v163_v61  ;;  %v142_v17 = vadd.f32 %v2782_v51, %v141_v63  ;;  %v1381_v61 = vsel %vm1365_vm10, 1, %v2382_v21  ;;  %vm1706_vm10 = vcmp.eq.s32.totalorder %v2693_v62, 4 }
  0xa8   :  { %1849 = vmatmul.msk.f32.gmra.mxu1 %vm63_vm0, %v2065_v0 }
  0xa9   :  { %1879 = vmatmul.msk.f32.gmra.mxu2 %vm63_vm0, %v2530_v25  ;;  %2068 = vtanh.f32 %v142_v17  ;;  %1921 = vmatmul.msk.f32.gmra.mxu0 %vm63_vm0, %v2530_v25 }
  0xaa   :  { %1083 = vperm.xlu2 %2041, %v1042_v59   ;;  %v1723_v59 = vsel %vm1707_vm9, 1, %v2382_v21 }
  0xab   :  { %1419 = vperm.xlu1 %2040, %v1382_v60   ;;  %1416 = vperm.xlu0 %2039, %v1381_v61   ;;  %v1722_v60 = vsel %vm1706_vm10, 1, %v2382_v21 }
  0xac   :  { %v165_v7 = vpop.f32.mrf.mxu2 }
  0xad   :  { %v2067_v8 = vpop.eup %2066  ;;  %v166_v10 = vadd.f32 %v2782_v51, %v165_v7 }
  0xae   :  { %1857 = vmatmul.msk.f32.gmra.mxu3 %vm63_vm0, %v2067_v8  ;;  %v144_v13 = vpop.f32.mrf.mxu0 }
  0xaf   :  { %v2069_v16 = vpop.eup %2068  ;;  %2070 = vtanh.f32 %v166_v10  ;;  %v145_v25 = vadd.f32 %v2782_v51, %v144_v13 }
  0xb0   :  { %1850 = vmatmul.msk.f32.gmra.mxu1 %vm63_vm0, %v2069_v16 }
  0xb1   :  { %1880 = vmatmul.msk.f32.gmra.mxu2 %vm63_vm0, %v2561_v32  ;;  %2072 = vtanh.f32 %v145_v25  ;;  %1922 = vmatmul.msk.f32.gmra.mxu0 %vm63_vm0, %v2561_v32  ;;  %v1374_v25 = vsel %vm1358_vm14, 1, %v2382_v21  ;;  %vm1699_vm14 = vcmp.eq.s32.totalorder %v2553_v29, 4  ;;  %v1728_v29 = vsel %vm1712_vm1, 1, %v2382_v21 }
  0xb2   :  { %1092 = vperm.xlu2 %2041, %v1045_v4  }
  0xb3   :  { %1428 = vperm.xlu1 %2040, %v1385_v6  }
  0xb4   :  { %v168_v27 = vpop.f32.mrf.mxu2 }
  0xb5   :  { %v2071_v30 = vpop.eup %2070  ;;  %v169_v31 = vadd.f32 %v2782_v51, %v168_v27 }
  0xb6   :  { %1858 = vmatmul.msk.f32.gmra.mxu3 %vm63_vm0, %v2071_v30  ;;  %v147_v34 = vpop.f32.mrf.mxu0 }
  0xb7   :  { %v2073_v37 = vpop.eup %2072  ;;  %2074 = vtanh.f32 %v169_v31  ;;  %v148_v32 = vadd.f32 %v2782_v51, %v147_v34  ;;  %v1969_v31 = vld [vmem:[%s3621_s4 + $0x70] sm:$0xff]  ;;  %v1377_v34 = vsel %vm1361_vm2, 1, %v2382_v21  ;;  %vm1702_vm2 = vcmp.eq.s32.totalorder %v2655_v52, 4  ;;  %v2010_v52 = vld [vmem:[%s3621_s4 + $0x88] sm:$0xff] }
  0xb8   :  { %1851 = vmatmul.msk.f32.gmra.mxu1 %vm63_vm0, %v2073_v37  ;;  %1288 = vmatpush.msra.mxu3 %v1969_v31  ;;  %v1717_v37 = vsel %vm1701_vm3, 1, %v2382_v21  ;;  %vm1705_vm3 = vcmp.eq.s32.totalorder %v2578_v35, 4 }
  0xb9   :  { %1881 = vmatmul.msk.f32.gmra.mxu2 %vm63_vm0, %v2592_v39  ;;  %2076 = vtanh.f32 %v148_v32  ;;  %1923 = vmatmul.msk.f32.gmra.mxu0 %vm63_vm0, %v2592_v39  ;;  %v1716_v32 = vsel %vm1700_vm4, 1, %v2382_v21 }
  0xba   :  { %1395 = vperm.xlu2 %2041, %v1374_v25   ;;  %1631 = vmatpush.msra.mxu1 %v2010_v52 }
  0xbb   :  { %1731 = vperm.xlu1 %2040, %v1714_v19   ;;  %v1718_v19 = vsel %vm1702_vm2, 1, %v2382_v21 }
  0xbc   :  { %v171_v50 = vpop.f32.mrf.mxu2 }
  0xbd   :  { %v2075_v14 = vpop.eup %2074  ;;  %v172_v54 = vadd.f32 %v2782_v51, %v171_v50  ;;  %v1380_v50 = vsel %vm1364_vm5, 1, %v2382_v21 }
  0xbe   :  { %1859 = vmatmul.msk.f32.gmra.mxu3 %vm63_vm0, %v2075_v14  ;;  %v150_v55 = vpop.f32.mrf.mxu0  ;;  %v1720_v14 = vsel %vm1704_vm6, 1, %v2382_v21 }
  0xbf   :  { %v2077_v56 = vpop.eup %2076  ;;  %2078 = vtanh.f32 %v172_v54  ;;  %v151_v39 = vadd.f32 %v2782_v51, %v150_v55  ;;  %v1719_v54 = vsel %vm1703_vm7, 1, %v2382_v21 }
  0xc0   :  { %1852 = vmatmul.msk.f32.gmra.mxu1 %vm63_vm0, %v2077_v56 }
  0xc1   :  { %1882 = vmatmul.msk.f32.gmra.mxu2 %vm63_vm0, %v2620_v45  ;;  %2080 = vtanh.f32 %v151_v39  ;;  %1924 = vmatmul.msk.f32.gmra.mxu0 %vm63_vm0, %v2620_v45 }
  0xc2   :  { %1404 = vperm.xlu2 %2041, %v1377_v34   ;;  %v1721_v34 = vsel %vm1705_vm3, 1, %v2382_v21 }
  0xc3   :  { %1740 = vperm.xlu1 %2040, %v1717_v37   ;;  %v2372_v37 = vld [vmem:[%s3618_s0 + $0x40] sm:$0xff] }
  0xc4   :  { %v174_v63 = vpop.f32.mrf.mxu2 }
  0xc5   :  { %v2079_v0 = vpop.eup %2078  ;;  %v175_v17 = vadd.f32 %v2782_v51, %v174_v63  ;;  %v1384_v51 = vsel %vm1368_vm13, 1, %v2382_v21  ;;  %vm1709_vm13 = vcmp.eq.s32.totalorder %v2708_v2, 4 }
  0xc6   :  { %1860 = vmatmul.msk.f32.gmra.mxu3 %vm63_vm0, %v2079_v0  ;;  %v811_v1 = vpop.f32.mrf.mxu0  ;;  %1425 = vperm.xlu0 %2039, %v1384_v51   ;;  %v1725_v48 = vsel %vm1709_vm13, 1, %v2382_v21  ;;  %v1968_v51 = vld [vmem:[%s3621_s4 + $0x68] sm:$0xff] }
  0xc7   :  { %v2081_v45 = vpop.eup %2080  ;;  %2082 = vtanh.f32 %v175_v17  ;;  %v812_v3 = vadd.f32 %v2925_v41, %v811_v1  ;;  %v1726_v1 = vsel %vm1710_vm12, 1, %v2382_v21  ;;  %1289 = vmatpush.msra.mxu3 %v1968_v51 }
  0xc8   :  { %1853 = vmatmul.msk.f32.gmra.mxu1 %vm63_vm0, %v2081_v45 }
  0xc9   :  { %1951 = vmatmul.msk.f32.vlgmr.msra.gmra.mxu2 %vm63_vm0, %v2438_v5  ;;  %2084 = vtanh.f32 %v812_v3  ;;  %1993 = vmatmul.msk.f32.vlgmr.msra.gmra.mxu0 %vm63_vm0, %v2438_v5 }
  0xca   :  { %1413 = vperm.xlu2 %2041, %v1380_v50  }
  0xcb   :  { %1749 = vperm.xlu1 %2040, %v1720_v14  }
  0xcc   :  { %v469_v7 = vpop.f32.mrf.mxu2 }
  0xcd   :  { %v2083_v8 = vpop.eup %2082  ;;  %v470_v10 = vadd.f32 %v2942_v47, %v469_v7  ;;  %v1715_v7 = vsel %vm1699_vm14, 1, %v2382_v21  ;;  %vm410_vm14 = vcmp.eq.s32.totalorder %v3039_v53, 1 }
  0xce   :  { %1861 = vmatmul.msk.f32.gmra.mxu3 %vm63_vm0, %v2083_v8  ;;  %v814_v13 = vpop.f32.mrf.mxu0  ;;  %1434 = vperm.xlu0 %2039, %v1387_v23   ;;  %v1729_v8 = vsel %vm1713_vm15, 1, %v2382_v21  ;;  %v3053_v23 = vpop.permute.xlu1 %369 }
  0xcf   :  { %v2085_v16 = vpop.eup %2084  ;;  %2086 = vtanh.f32 %v470_v10  ;;  %v815_v5 = vadd.f32 %v2925_v41, %v814_v13  ;;  %v3041_v10 = vpop.permute.xlu2 %375 }
  0xd0   :  { %1930 = vmatmul.msk.f32.vlgmr.msrb.gmra.mxu1 %vm63_vm0, %v2085_v16 }
  0xd1   :  { %1952 = vmatmul.msk.f32.gmra.mxu2 %vm63_vm0, %v2467_v12  ;;  %2088 = vtanh.f32 %v815_v5  ;;  %1994 = vmatmul.msk.f32.gmra.mxu0 %vm63_vm0, %v2467_v12 }
  0xd2   :  { %1422 = vperm.xlu2 %2041, %v1383_v57   ;;  %v3101_v57 = vld [vmem:[%s3622_s5] ss:$0 sm:$0xff] }
  0xd3   :  { %1758 = vperm.xlu1 %2040, %v1723_v59  }
  0xd4   :  { %v472_v22 = vpop.f32.mrf.mxu2 }
  0xd5   :  { %v2087_v24 = vpop.eup %2086  ;;  %v473_v11 = vadd.f32 %v2942_v47, %v472_v22  ;;  %v3058_v22 = vpop.permute.xlu0 %366 }
  0xd6   :  { %1888 = vmatmul.msk.f32.vlgmr.msrb.gmra.mxu3 %vm63_vm0, %v2087_v24  ;;  %v817_v27 = vpop.f32.mrf.mxu0  ;;  %1737 = vperm.xlu0 %2039, %v1716_v32   ;;  %v3073_v32 = vpop.permute.xlu1 %372  ;;  %vm411_vm2 = vcmp.eq.s32.totalorder %v3058_v22, 1 }
  0xd7   :  { %v2089_v30 = vpop.eup %2088  ;;  %2090 = vtanh.f32 %v473_v11  ;;  %v818_v12 = vadd.f32 %v2925_v41, %v817_v27 }
  0xd8   :  { %1931 = vmatmul.msk.f32.gmra.mxu1 %vm63_vm0, %v2089_v30  ;;  %v3061_v30 = vpop.permute.xlu2 %378 }
  0xd9   :  { %1953 = vmatmul.msk.f32.gmra.mxu2 %vm63_vm0, %v2484_v15  ;;  %2092 = vtanh.f32 %v818_v12  ;;  %1995 = vmatmul.msk.f32.gmra.mxu0 %vm63_vm0, %v2484_v15 }
  0xdb   :  { %1767 = vperm.xlu1 %2040, %v1726_v1  }
  0xdc   :  { %v475_v20 = vpop.f32.mrf.mxu2 }
  0xdd   :  { %v2091_v28 = vpop.eup %2090  ;;  %v476_v38 = vadd.f32 %v2942_v47, %v475_v20 }
  0xde   :  { %1889 = vmatmul.msk.f32.gmra.mxu3 %vm63_vm0, %v2091_v28  ;;  %v820_v43 = vpop.f32.mrf.mxu0  ;;  %1746 = vperm.xlu0 %2039, %v1719_v54  }
  0xdf   :  { %v2093_v44 = vpop.eup %2092  ;;  %2094 = vtanh.f32 %v476_v38  ;;  %v821_v15 = vadd.f32 %v2925_v41, %v820_v43  ;;  %v3078_v43 = vpop.permute.xlu0 %381 }
  0xe0   :  { %1932 = vmatmul.msk.f32.gmra.mxu1 %vm63_vm0, %v2093_v44  ;;  %v388_v54 = vpop.permute.xlu2 %387 }
  0xe1   :  { %1954 = vmatmul.msk.f32.gmra.mxu2 %vm63_vm0, %v2501_v18  ;;  %2096 = vtanh.f32 %v821_v15  ;;  %1996 = vmatmul.msk.f32.gmra.mxu0 %vm63_vm0, %v2501_v18  ;;  %v2373_v15 = vld [vmem:[%s3620_s1 + $0x50] sm:$0xff]  ;;  %vm418_vm6 = vcmp.eq.s32.totalorder %v388_v54, 1 }
  0xe2   :  { %vm1708_vm4 = vcmp.eq.s32.totalorder %v2373_v15, 4 }
  0xe3   :  { %1776 = vperm.xlu1 %2040, %v1729_v8   ;;  %v1724_v14 = vsel %vm1708_vm4, 1, %v2382_v21  ;;  %v2377_v8 = vld [vmem:[%s3618_s0 + $0x58] sm:$0xff] }
  0xe4   :  { %v478_v36 = vpop.f32.mrf.mxu2 }
  0xe5   :  { %v2095_v58 = vpop.eup %2094  ;;  %v479_v55 = vadd.f32 %v2942_v47, %v478_v36  ;;  %v2374_v36 = vld [vmem:[%s3618_s0 + $0x48] sm:$0xff] }
  0xe6   :  { %1890 = vmatmul.msk.f32.gmra.mxu3 %vm63_vm0, %v2095_v58  ;;  %v823_v56 = vpop.f32.mrf.mxu0  ;;  %1755 = vperm.xlu0 %2039, %v1722_v60   ;;  %v2375_v60 = vld [vmem:[%s3620_s1 + $0x68] sm:$0xff] }
  0xe7   :  { %v2097_v39 = vpop.eup %2096  ;;  %2098 = vtanh.f32 %v479_v55  ;;  %v824_v18 = vadd.f32 %v2925_v41, %v823_v56  ;;  %vm1711_vm5 = vcmp.eq.s32.totalorder %v2375_v60, 4 }
  0xe8   :  { %1933 = vmatmul.msk.f32.gmra.mxu1 %vm63_vm0, %v2097_v39 }
  0xe9   :  { %1955 = vmatmul.msk.f32.gmra.mxu2 %vm63_vm0, %v2535_v26  ;;  %2100 = vtanh.f32 %v824_v18  ;;  %1997 = vmatmul.msk.f32.gmra.mxu0 %vm63_vm0, %v2535_v26  ;;  %v1386_v26 = vsel %vm1370_vm11, 1, %v2382_v21  ;;  %v3095_v18 = vpop.permute.xlu1 %384 }
  0xea   :  { %1431 = vperm.xlu2 %2041, %v1386_v26   ;;  %v3114_v26 = vpop.permute.xlu2 %396 }
  0xeb   :  { %vm421_vm9 = vcmp.eq.s32.totalorder %v3114_v26, 1 }
  0xec   :  { %v481_v42 = vpop.f32.mrf.mxu2 }
  0xed   :  { %v2099_v62 = vpop.eup %2098  ;;  %v482_v61 = vadd.f32 %v2942_v47, %v481_v42 }
  0xee   :  { %1891 = vmatmul.msk.f32.gmra.mxu3 %vm63_vm0, %v2099_v62  ;;  %v826_v63 = vpop.f32.mrf.mxu0  ;;  %1764 = vperm.xlu0 %2039, %v1725_v48  }
  0xef   :  { %v2101_v0 = vpop.eup %2100  ;;  %2102 = vtanh.f32 %v482_v61  ;;  %v827_v17 = vadd.f32 %v2925_v41, %v826_v63  ;;  %v1727_v61 = vsel %vm1711_vm5, 1, %v2382_v21  ;;  %v391_v63 = vpop.permute.xlu0 %390  ;;  %v1967_v21 = vld [vmem:[%s3621_s4 + $0x60] sm:$0xff]  ;;  %vm412_vm5 = vcmp.eq.s32.totalorder %v3053_v23, 1 }
  0xf0   :  { %1934 = vmatmul.msk.f32.gmra.mxu1 %vm63_vm0, %v2101_v0  ;;  %1290 = vmatpush.msra.mxu3 %v1967_v21  ;;  %vm419_vm7 = vcmp.eq.s32.totalorder %v391_v63, 1 }
  0xf1   :  { %1956 = vmatmul.msk.f32.gmra.mxu2 %vm63_vm0, %v2566_v33  ;;  %2104 = vtanh.f32 %v827_v17  ;;  %1998 = vmatmul.msk.f32.gmra.mxu0 %vm63_vm0, %v2566_v33  ;;  %v2376_v17 = vld [vmem:[%s3618_s0 + $0x50] sm:$0xff]  ;;  %v394_v51 = vpop.permute.xlu1 %393 }
  0xf2   :  { %1734 = vperm.xlu2 %2041, %v1715_v7   ;;  %vm420_vm8 = vcmp.eq.s32.totalorder %v394_v51, 1 }
  0xf4   :  { %v484_v45 = vpop.f32.mrf.mxu2 }
  0xf5   :  { %v2103_v3 = vpop.eup %2102  ;;  %v485_v4 = vadd.f32 %v2942_v47, %v484_v45 }
  0xf6   :  { %1892 = vmatmul.msk.f32.gmra.mxu3 %vm63_vm0, %v2103_v3  ;;  %v829_v6 = vpop.f32.mrf.mxu0  ;;  %1773 = vperm.xlu0 %2039, %v1728_v29  }
  0xf7   :  { %v2105_v2 = vpop.eup %2104  ;;  %2106 = vtanh.f32 %v485_v4  ;;  %v830_v33 = vadd.f32 %v2925_v41, %v829_v6 }
  0xf8   :  { %1935 = vmatmul.msk.f32.gmra.mxu1 %vm63_vm0, %v2105_v2 }
  0xf9   :  { %1957 = vmatmul.msk.f32.gmra.mxu2 %vm63_vm0, %v2597_v40  ;;  %2108 = vtanh.f32 %v830_v33  ;;  %1999 = vmatmul.msk.f32.gmra.mxu0 %vm63_vm0, %v2597_v40 }
  0xfa   :  { %1743 = vperm.xlu2 %2041, %v1718_v19  }
  0xfc   :  { %v487_v13 = vpop.f32.mrf.mxu2 }
  0xfd   :  { %v2107_v16 = vpop.eup %2106  ;;  %v488_v9 = vadd.f32 %v2942_v47, %v487_v13  ;;  %v3131_v13 = vpop.permute.xlu0 %399 }
  0xfe   :  { %1893 = vmatmul.msk.f32.gmra.mxu3 %vm63_vm0, %v2107_v16  ;;  %v832_v5 = vpop.f32.mrf.mxu0  ;;  %vm422_vm10 = vcmp.eq.s32.totalorder %v3131_v13, 1 }
  0xff   :  { %v2109_v25 = vpop.eup %2108  ;;  %2110 = vtanh.f32 %v488_v9  ;;  %v833_v40 = vadd.f32 %v2925_v41, %v832_v5  ;;  %v2009_v5 = vld [vmem:[%s3621_s4 + $0x80] sm:$0xff] }
 0x100   :  { %1936 = vmatmul.msk.f32.gmra.mxu1 %vm63_vm0, %v2109_v25  ;;  %v3139_v25 = vpop.permute.xlu2 %405 }
 0x101   :  { %1958 = vmatmul.msk.f32.gmra.mxu2 %vm63_vm0, %v2625_v46  ;;  %2112 = vtanh.f32 %v833_v40  ;;  %2000 = vmatmul.msk.f32.gmra.mxu0 %vm63_vm0, %v2625_v46  ;;  %vm424_vm12 = vcmp.eq.s32.totalorder %v3139_v25, 1 }
 0x102   :  { %1752 = vperm.xlu2 %2041, %v1721_v34   ;;  %1632 = vmatpush.msra.mxu1 %v2009_v5 }
 0x104   :  { %v490_v24 = vpop.f32.mrf.mxu2 }
 0x105   :  { %v2111_v11 = vpop.eup %2110  ;;  %v491_v27 = vadd.f32 %v2942_v47, %v490_v24 }
 0x106   :  { %1894 = vmatmul.msk.f32.gmra.mxu3 %vm63_vm0, %v2111_v11  ;;  %v835_v12 = vpop.f32.mrf.mxu0 }
 0x107   :  { %v2113_v46 = vpop.eup %2112  ;;  %2114 = vtanh.f32 %v491_v27  ;;  %v836_v31 = vadd.f32 %v2925_v41, %v835_v12 }
 0x108   :  { %1937 = vmatmul.msk.f32.gmra.mxu1 %vm63_vm0, %v2113_v46 }
 0x109   :  { %1959 = vmatmul.msk.f32.gmra.mxu2 %vm63_vm0, %v2372_v37  ;;  %2116 = vtanh.f32 %v836_v31  ;;  %2001 = vmatmul.msk.f32.gmra.mxu0 %vm63_vm0, %v2372_v37  ;;  %v2378_v31 = vld [vmem:[%s3618_s0 + $0x60] sm:$0xff]  ;;  %v3152_v37 = vpop.permute.xlu1 %402 }
 0x10a   :  { %1761 = vperm.xlu2 %2041, %v1724_v14   ;;  %v3162_v14 = vpop.permute.xlu2 %708  ;;  %vm423_vm11 = vcmp.eq.s32.totalorder %v3152_v37, 1 }
 0x10b   :  { %vm753_vm3 = vcmp.eq.s32.totalorder %v3162_v14, 1 }
 0x10c   :  { %v493_v35 = vpop.f32.mrf.mxu2 }
 0x10d   :  { %v2115_v20 = vpop.eup %2114  ;;  %v494_v28 = vadd.f32 %v2942_v47, %v493_v35  ;;  %v3076_v38 = vpop.f32.mrf.mxu1 }
 0x10e   :  { %1895 = vmatmul.msk.f32.gmra.mxu3 %vm63_vm0, %v2115_v20  ;;  %v838_v44 = vpop.f32.mrf.mxu0  ;;  %v267_v25 = vadd.f32 %v3101_v57, %v3076_v38 }
 0x10f   :  { %v2117_v49 = vpop.eup %2116  ;;  %2118 = vtanh.f32 %v494_v28  ;;  %v839_v50 = vadd.f32 %v2925_v41, %v838_v44  ;;  %v3157_v28 = vpop.permute.xlu0 %408 }
 0x110   :  { %1938 = vmatmul.msk.f32.gmra.mxu1 %vm63_vm0, %v2117_v49  ;;  %vm425_vm13 = vcmp.eq.s32.totalorder %v3157_v28, 1 }
 0x111   :  { %1960 = vmatmul.msk.f32.gmra.mxu2 %vm63_vm0, %v2374_v36  ;;  %2120 = vtanh.f32 %v839_v50  ;;  %2002 = vmatmul.msk.f32.gmra.mxu0 %vm63_vm0, %v2374_v36 }
 0x112   :  { %1770 = vperm.xlu2 %2041, %v1727_v61  }
 0x114   :  { %v496_v58 = vpop.f32.mrf.mxu2 }
 0x115   :  { %v2119_v55 = vpop.eup %2118  ;;  %v497_v56 = vadd.f32 %v2942_v47, %v496_v58  ;;  %v3093_v39 = vpop.f32.mrf.mxu1 }
 0x116   :  { %1896 = vmatmul.msk.f32.gmra.mxu3 %vm63_vm0, %v2119_v55  ;;  %v841_v59 = vpop.f32.mrf.mxu0 }
 0x117   :  { %v2121_v42 = vpop.eup %2120  ;;  %2122 = vtanh.f32 %v497_v56  ;;  %v842_v62 = vadd.f32 %v2925_v41, %v841_v59  ;;  %v2379_v56 = vld [vmem:[%s3618_s0 + $0x68] sm:$0xff] }
 0x118   :  { %1939 = vmatmul.msk.f32.gmra.mxu1 %vm63_vm0, %v2121_v42 }
 0x119   :  { %v290_v0 = vpop.f32.mrf.mxu3  ;;  %1961 = vmatmul.msk.f32.gmra.mxu2 %vm63_vm0, %v2376_v17  ;;  %2124 = vtanh.f32 %v842_v62  ;;  %2003 = vmatmul.msk.f32.gmra.mxu0 %vm63_vm0, %v2376_v17  ;;  %v3175_v62 = vpop.permute.xlu1 %705 }
 0x11a   :  { %v291_v1 = vadd.f32 %v3101_v57, %v290_v0  ;;  %vm752_vm15 = vcmp.eq.s32.totalorder %v3175_v62, 1 }
 0x11c   :  { %2126 = vtanh.f32 %v291_v1  ;;  %v499_v48 = vpop.f32.mrf.mxu2  ;;  %v3180_v1 = vpop.permute.xlu0 %711 }
 0x11d   :  { %v2123_v45 = vpop.eup %2122  ;;  %v500_v3 = vadd.f32 %v2942_v47, %v499_v48  ;;  %v3121_v4 = vpop.f32.mrf.mxu1 }
 0x11e   :  { %1897 = vmatmul.msk.f32.gmra.mxu3 %vm63_vm0, %v2123_v45  ;;  %v844_v6 = vpop.f32.mrf.mxu0 }
 0x11f   :  { %v2125_v2 = vpop.eup %2124  ;;  %2128 = vtanh.f32 %v500_v3  ;;  %v845_v33 = vadd.f32 %v2925_v41, %v844_v6  ;;  %v3185_v3 = vpop.permute.xlu2 %717 }
 0x120   :  { %1940 = vmatmul.msk.f32.gmra.mxu1 %vm63_vm0, %v2125_v2  ;;  %v2380_v2 = vld [vmem:[%s3618_s0 + $0x70] sm:$0xff] }
 0x121   :  { %v293_v7 = vpop.f32.mrf.mxu3  ;;  %1962 = vmatmul.msk.f32.gmra.mxu2 %vm63_vm0, %v2377_v8  ;;  %2130 = vtanh.f32 %v845_v33  ;;  %2004 = vmatmul.msk.f32.gmra.mxu0 %vm63_vm0, %v2377_v8  ;;  %v3199_v5 = vpop.permute.xlu1 %714 }
 0x122   :  { %v2127_v29 = vpop.eup %2126  ;;  %v294_v16 = vadd.f32 %v3101_v57, %v293_v7 }
 0x123   :  { %v3134_v9 = vsel %vm418_vm6, %v2127_v29, 0.0  ;;  %vm754_vm6 = vcmp.eq.s32.totalorder %v3180_v1, 1 }
 0x124   :  { %2132 = vtanh.f32 %v294_v16  ;;  %v502_v40 = vpop.f32.mrf.mxu2 }
 0x125   :  { %v2129_v19 = vpop.eup %2128  ;;  %v503_v52 = vadd.f32 %v2942_v47, %v502_v40  ;;  %v3142_v24 = vpop.f32.mrf.mxu1 }
 0x126   :  { %1898 = vmatmul.msk.f32.gmra.mxu3 %vm63_vm0, %v2129_v19  ;;  %v847_v11 = vpop.f32.mrf.mxu0 }
 0x127   :  { %v2131_v27 = vpop.eup %2130  ;;  %2134 = vtanh.f32 %v503_v52  ;;  %v848_v12 = vadd.f32 %v2925_v41, %v847_v11  ;;  %v3204_v11 = vpop.permute.xlu0 %720 }
 0x128   :  { %1941 = vmatmul.msk.f32.gmra.mxu1 %vm63_vm0, %v2131_v27 }
 0x129   :  { %v296_v46 = vpop.f32.mrf.mxu3  ;;  %1963 = vmatmul.msk.f32.gmra.mxu2 %vm63_vm0, %v2378_v31  ;;  %2136 = vtanh.f32 %v848_v12  ;;  %2005 = vmatmul.msk.f32.gmra.mxu0 %vm63_vm0, %v2378_v31  ;;  %v2381_v12 = vld [vmem:[%s3618_s0 + $0x78] sm:$0xff]  ;;  %v3212_v31 = vpop.permute.xlu2 %726 }
 0x12a   :  { %v2133_v34 = vpop.eup %2132  ;;  %v297_v35 = vadd.f32 %v3101_v57, %v296_v46 }
 0x12b   :  { %v3155_v20 = vsel %vm419_vm7, %v2133_v34, 0.0  ;;  %v3220_v34 = vld [vmem:[%s3619_s3 + $0x4] ss:$0 sm:$0xff] }
 0x12c   :  { %2138 = vtanh.f32 %v297_v35  ;;  %v505_v44 = vpop.f32.mrf.mxu2 }
 0x12d   :  { %v2135_v15 = vpop.eup %2134  ;;  %v506_v49 = vadd.f32 %v2942_v47, %v505_v44  ;;  %v3160_v50 = vpop.f32.mrf.mxu1 }
 0x12e   :  { %1899 = vmatmul.msk.f32.gmra.mxu3 %vm63_vm0, %v2135_v15  ;;  %v850_v54 = vpop.f32.mrf.mxu0 }
 0x12f   :  { %v2137_v36 = vpop.eup %2136  ;;  %2140 = vtanh.f32 %v506_v49  ;;  %v851_v58 = vadd.f32 %v2925_v41, %v850_v54 }
 0x130   :  { %1942 = vmatmul.msk.f32.gmra.mxu1 %vm63_vm0, %v2137_v36 }
 0x131   :  { %v299_v55 = vpop.f32.mrf.mxu3  ;;  %1964 = vmatmul.msk.f32.gmra.mxu2 %vm63_vm0, %v2379_v56  ;;  %2142 = vtanh.f32 %v851_v58  ;;  %2006 = vmatmul.msk.f32.gmra.mxu0 %vm63_vm0, %v2379_v56 }
 0x132   :  { %v2139_v59 = vpop.eup %2138  ;;  %v300_v60 = vadd.f32 %v3101_v57, %v299_v55  ;;  %v3228_v55 = vpop.permute.xlu1 %723 }
 0x133   :  { %v3173_v42 = vsel %vm420_vm8, %v2139_v59, 0.0  ;;  %vm413_vm8 = vcmp.eq.s32.totalorder %v3073_v32, 1 }
 0x134   :  { %2144 = vtanh.f32 %v300_v60  ;;  %v508_v61 = vpop.f32.mrf.mxu2  ;;  %v3236_v60 = vpop.permute.xlu0 %729 }
 0x135   :  { %v2141_v63 = vpop.eup %2140  ;;  %v509_v0 = vadd.f32 %v2942_v47, %v508_v61  ;;  %v3178_v17 = vpop.f32.mrf.mxu1 }
 0x136   :  { %1900 = vmatmul.msk.f32.gmra.mxu3 %vm63_vm0, %v2141_v63  ;;  %v853_v21 = vpop.f32.mrf.mxu0 }
 0x137   :  { %v2143_v48 = vpop.eup %2142  ;;  %2146 = vtanh.f32 %v509_v0  ;;  %v854_v45 = vadd.f32 %v2925_v41, %v853_v21  ;;  %v3241_v0 = vpop.permute.xlu2 %735 }
 0x138   :  { %1943 = vmatmul.msk.f32.gmra.mxu1 %vm63_vm0, %v2143_v48 }
 0x139   :  { %v302_v6 = vpop.f32.mrf.mxu3  ;;  %1965 = vmatmul.msk.f32.gmra.mxu2 %vm63_vm0, %v2380_v2  ;;  %2148 = vtanh.f32 %v854_v45  ;;  %2007 = vmatmul.msk.f32.gmra.mxu0 %vm63_vm0, %v2380_v2 }
 0x13a   :  { %v2145_v33 = vpop.eup %2144  ;;  %v303_v51 = vadd.f32 %v3101_v57, %v302_v6 }
 0x13b   :  { %v3194_v7 = vsel %vm421_vm9, %v2145_v33, 0.0  ;;  %vm755_vm9 = vcmp.eq.s32.totalorder %v3199_v5, 1 }
 0x13c   :  { %2150 = vtanh.f32 %v303_v51  ;;  %v511_v26 = vpop.f32.mrf.mxu2 }
 0x13d   :  { %v2147_v8 = vpop.eup %2146  ;;  %v512_v29 = vadd.f32 %v2942_v47, %v511_v26  ;;  %v3197_v16 = vpop.f32.mrf.mxu1 }
 0x13e   :  { %1901 = vmatmul.msk.f32.gmra.mxu3 %vm63_vm0, %v2147_v8  ;;  %v856_v40 = vpop.f32.mrf.mxu0  ;;  %v3248_v8 = vpop.permute.xlu1 %732 }
 0x13f   :  { %v2149_v19 = vpop.eup %2148  ;;  %2152 = vtanh.f32 %v512_v29  ;;  %v857_v52 = vadd.f32 %v2925_v41, %v856_v40 }
 0x140   :  { %1944 = vmatmul.msk.f32.gmra.mxu1 %vm63_vm0, %v2149_v19  ;;  %v3256_v19 = vld [vmem:[%s3622_s5 + $0x2] ss:$0 sm:$0xff] }
 0x141   :  { %v305_v27 = vpop.f32.mrf.mxu3  ;;  %1966 = vmatmul.msk.f32.gmra.mxu2 %vm63_vm0, %v2381_v12  ;;  %2154 = vtanh.f32 %v857_v52  ;;  %2008 = vmatmul.msk.f32.gmra.mxu0 %vm63_vm0, %v2381_v12  ;;  %v3258_v52 = vpop.permute.xlu0 %738 }
 0x142   :  { %v2151_v46 = vpop.eup %2150  ;;  %v306_v41 = vadd.f32 %v3101_v57, %v305_v27 }
 0x143   :  { %v3215_v13 = vsel %vm422_vm10, %v2151_v46, 0.0 }
 0x144   :  { %2156 = vtanh.f32 %v306_v41  ;;  %v514_v35 = vpop.f32.mrf.mxu2 }
 0x145   :  { %v2153_v44 = vpop.eup %2152  ;;  %v515_v15 = vadd.f32 %v2942_v47, %v514_v35  ;;  %v3223_v49 = vpop.f32.mrf.mxu1  ;;  %v3234_v47 = vld [vmem:[%s3619_s3 + $0x3] ss:$0 sm:$0xff] }
 0x146   :  { %1902 = vmatmul.msk.f32.gmra.mxu3 %vm63_vm0, %v2153_v44  ;;  %v1495_v54 = vpop.f32.mrf.mxu0  ;;  %v3263_v35 = vpop.permute.xlu2 %744  ;;  %v3269_v44 = vld [vmem:[%s3622_s5 + $0x1] ss:$0 sm:$0xff] }
 0x147   :  { %v2155_v36 = vpop.eup %2154  ;;  %2158 = vtanh.f32 %v515_v15  ;;  %v1496_v58 = vadd.f32 %v3220_v34, %v1495_v54 }
 0x148   :  { %1945 = vmatmul.msk.f32.gmra.mxu1 %vm63_vm0, %v2155_v36 }
 0x149   :  { %v308_v56 = vpop.f32.mrf.mxu3  ;;  %2160 = vtanh.f32 %v1496_v58 }
 0x14a   :  { %v2157_v59 = vpop.eup %2156  ;;  %v309_v61 = vadd.f32 %v3101_v57, %v308_v56 }
 0x14b   :  { %v3239_v63 = vsel %vm423_vm11, %v2157_v59, 0.0  ;;  %vm414_vm11 = vcmp.eq.s32.totalorder %v3041_v10, 1 }
 0x14c   :  { %2162 = vtanh.f32 %v309_v61  ;;  %v1153_v37 = vpop.f32.mrf.mxu2 }
 0x14d   :  { %v2159_v21 = vpop.eup %2158  ;;  %v1154_v48 = vadd.f32 %v3234_v47, %v1153_v37  ;;  %v950_v45 = vpop.f32.mrf.mxu1 }
 0x14e   :  { %1903 = vmatmul.msk.f32.gmra.mxu3 %vm63_vm0, %v2159_v21  ;;  %v1498_v6 = vpop.f32.mrf.mxu0  ;;  %v951_v38 = vadd.f32 %v3256_v19, %v950_v45  ;;  %v3278_v37 = vpop.permute.xlu1 %741  ;;  %v270_v21 = vadd.f32 %v3101_v57, %v3093_v39 }
 0x14f   :  { %v2161_v2 = vpop.eup %2160  ;;  %2164 = vtanh.f32 %v1154_v48  ;;  %v1499_v33 = vadd.f32 %v3220_v34, %v1498_v6 }
 0x150   :  { %2014 = vmatmul.msk.f32.vlgmr.msra.gmra.mxu1 %vm63_vm0, %v2161_v2 }
 0x151   :  { %v311_v51 = vpop.f32.mrf.mxu3  ;;  %2166 = vtanh.f32 %v1499_v33  ;;  %v3283_v33 = vpop.permute.xlu0 %747 }
 0x152   :  { %v2163_v26 = vpop.eup %2162  ;;  %v312_v29 = vadd.f32 %v3101_v57, %v311_v51 }
 0x153   :  { %v3251_v40 = vsel %vm424_vm12, %v2163_v26, 0.0  ;;  %vm756_vm12 = vcmp.eq.s32.totalorder %v3185_v3, 1 }
 0x154   :  { %2168 = vtanh.f32 %v312_v29  ;;  %v1156_v27 = vpop.f32.mrf.mxu2 }
 0x155   :  { %v2165_v12 = vpop.eup %2164  ;;  %v1157_v46 = vadd.f32 %v3234_v47, %v1156_v27  ;;  %v953_v41 = vpop.f32.mrf.mxu1 }
 0x156   :  { %1972 = vmatmul.msk.f32.vlgmr.msra.gmra.mxu3 %vm63_vm0, %v2165_v12  ;;  %v1501_v15 = vpop.f32.mrf.mxu0  ;;  %v954_v29 = vadd.f32 %v3256_v19, %v953_v41  ;;  %v273_v41 = vadd.f32 %v3101_v57, %v3121_v4 }
 0x157   :  { %v2167_v54 = vpop.eup %2166  ;;  %2170 = vtanh.f32 %v1157_v46  ;;  %v1502_v36 = vadd.f32 %v3220_v34, %v1501_v15 }
 0x158   :  { %2172 = vtanh.f32 %v267_v25  ;;  %2015 = vmatmul.msk.f32.gmra.mxu1 %vm63_vm0, %v2167_v54  ;;  %v1048_v25 = vpop.permute.xlu2 %1047 }
 0x159   :  { %v608_v58 = vpop.f32.mrf.mxu3  ;;  %2174 = vtanh.f32 %v1502_v36  ;;  %vm1094_vm1 = vcmp.eq.s32.totalorder %v1048_v25, 1 }
 0x15a   :  { %v2169_v56 = vpop.eup %2168  ;;  %v609_v59 = vadd.f32 %v3269_v44, %v608_v58  ;;  %2176 = vtanh.f32 %v951_v38 }
 0x15b   :  { %v3276_v61 = vsel %vm425_vm13, %v2169_v56, 0.0 }
 0x15c   :  { %2178 = vtanh.f32 %v609_v59  ;;  %v1159_v48 = vpop.f32.mrf.mxu2 }
 0x15d   :  { %v2171_v45 = vpop.eup %2170  ;;  %v1160_v28 = vadd.f32 %v3234_v47, %v1159_v48  ;;  %v956_v6 = vpop.f32.mrf.mxu1 }
 0x15e   :  { %v2173_v2 = vpop.eup %2172  ;;  %1973 = vmatmul.msk.f32.gmra.mxu3 %vm63_vm0, %v2171_v45  ;;  %v1504_v51 = vpop.f32.mrf.mxu0  ;;  %v957_v4 = vadd.f32 %v3256_v19, %v956_v6  ;;  %v276_v6 = vadd.f32 %v3101_v57, %v3142_v24 }
 0x15f   :  { %v2175_v26 = vpop.eup %2174  ;;  %2180 = vtanh.f32 %v1160_v28  ;;  %v1505_v39 = vadd.f32 %v3220_v34, %v1504_v51  ;;  %v426_v15 = vsel %vm410_vm14, %v2173_v2, 0.0  ;;  %v1051_v2 = vpop.permute.xlu0 %1050  ;;  %vm415_vm14 = vcmp.eq.s32.totalorder %v3061_v30, 1 }
 0x160   :  { %2182 = vtanh.f32 %v270_v21  ;;  %2016 = vmatmul.msk.f32.gmra.mxu1 %vm63_vm0, %v2175_v26  ;;  %v2177_v27 = vpop.eup %2176  ;;  %v3297_v21 = vpop.permute.xlu1 %750  ;;  %vm1095_vm4 = vcmp.eq.s32.totalorder %v1051_v2, 1 }
 0x161   :  { %v611_v12 = vpop.f32.mrf.mxu3  ;;  %2184 = vtanh.f32 %v1505_v39 }
 0x162   :  { %v2179_v46 = vpop.eup %2178  ;;  %v612_v54 = vadd.f32 %v3269_v44, %v611_v12  ;;  %2186 = vtanh.f32 %v954_v29 }
 0x163   :  { %v768_v53 = vsel %vm752_vm15, %v2179_v46, %v426_v15  ;;  %vm757_vm15 = vcmp.eq.s32.totalorder %v3204_v11, 1 }
 0x164   :  { %v3294_v38 = vsel %vm1094_vm1, %v2177_v27, %v768_v53  ;;  %2188 = vtanh.f32 %v612_v54  ;;  %v1162_v62 = vpop.f32.mrf.mxu2 }
 0x165   :  { %v2181_v36 = vpop.eup %2180  ;;  %v1163_v58 = vadd.f32 %v3234_v47, %v1162_v62  ;;  %v959_v56 = vpop.f32.mrf.mxu1 }
 0x166   :  { %v2183_v59 = vpop.eup %2182  ;;  %1974 = vmatmul.msk.f32.gmra.mxu3 %vm63_vm0, %v2181_v36  ;;  %v1507_v48 = vpop.f32.mrf.mxu0  ;;  %v960_v62 = vadd.f32 %v3256_v19, %v959_v56  ;;  %v279_v56 = vadd.f32 %v3101_v57, %v3160_v50 }
 0x167   :  { %v2185_v45 = vpop.eup %2184  ;;  %2190 = vtanh.f32 %v1163_v58  ;;  %v1508_v28 = vadd.f32 %v3220_v34, %v1507_v48  ;;  %v427_v39 = vsel %vm411_vm2, %v2183_v59, 0.0  ;;  %vm416_vm2 = vcmp.eq.s32.totalorder %v3078_v43, 1 }
 0x168   :  { %2192 = vtanh.f32 %v273_v41  ;;  %2017 = vmatmul.msk.f32.gmra.mxu1 %vm63_vm0, %v2185_v45  ;;  %v2187_v51 = vpop.eup %2186  ;;  %v1054_v36 = vpop.permute.xlu1 %1053 }
 0x169   :  { %v614_v26 = vpop.f32.mrf.mxu3  ;;  %2194 = vtanh.f32 %v1508_v28  ;;  %vm1096_vm7 = vcmp.eq.s32.totalorder %v1054_v36, 1 }
 0x16a   :  { %v2189_v29 = vpop.eup %2188  ;;  %v615_v25 = vadd.f32 %v3269_v44, %v614_v26  ;;  %2196 = vtanh.f32 %v957_v4 }
 0x16b   :  { %v769_v22 = vsel %vm753_vm3, %v2189_v29, %v427_v39 }
 0x16c   :  { %v3308_v27 = vsel %vm1095_vm4, %v2187_v51, %v769_v22  ;;  %2198 = vtanh.f32 %v615_v25  ;;  %v1165_v14 = vpop.f32.mrf.mxu2  ;;  %vm758_vm4 = vcmp.eq.s32.totalorder %v3228_v55, 1 }
 0x16d   :  { %v2191_v12 = vpop.eup %2190  ;;  %v1166_v46 = vadd.f32 %v3234_v47, %v1165_v14  ;;  %v962_v15 = vpop.f32.mrf.mxu1 }
 0x16e   :  { %v2193_v54 = vpop.eup %2192  ;;  %1975 = vmatmul.msk.f32.gmra.mxu3 %vm63_vm0, %v2191_v12  ;;  %v1510_v53 = vpop.f32.mrf.mxu0  ;;  %v963_v22 = vadd.f32 %v3256_v19, %v962_v15  ;;  %v282_v15 = vadd.f32 %v3101_v57, %v3178_v17 }
 0x16f   :  { %v2195_v41 = vpop.eup %2194  ;;  %2200 = vtanh.f32 %v1166_v46  ;;  %v1511_v24 = vadd.f32 %v3220_v34, %v1510_v53  ;;  %v428_v45 = vsel %vm412_vm5, %v2193_v54, 0.0  ;;  %vm417_vm5 = vcmp.eq.s32.totalorder %v3095_v18, 1 }
 0x170   :  { %2202 = vtanh.f32 %v276_v6  ;;  %2018 = vmatmul.msk.f32.gmra.mxu1 %vm63_vm0, %v2195_v41  ;;  %v2197_v58 = vpop.eup %2196  ;;  %v1057_v6 = vpop.permute.xlu2 %1056 }
 0x171   :  { %v617_v59 = vpop.f32.mrf.mxu3  ;;  %2204 = vtanh.f32 %v1511_v24  ;;  %vm1097_vm10 = vcmp.eq.s32.totalorder %v1057_v6, 1 }
 0x172   :  { %v2199_v48 = vpop.eup %2198  ;;  %v618_v4 = vadd.f32 %v3269_v44, %v617_v59  ;;  %2206 = vtanh.f32 %v960_v62 }
 0x173   :  { %v770_v23 = vsel %vm754_vm6, %v2199_v48, %v428_v45  ;;  %vm759_vm6 = vcmp.eq.s32.totalorder %v3212_v31, 1 }
 0x174   :  { %v3320_v28 = vsel %vm1096_vm7, %v2197_v58, %v770_v23  ;;  %2208 = vtanh.f32 %v618_v4  ;;  %v1168_v1 = vpop.f32.mrf.mxu2  ;;  %v1060_v4 = vpop.permute.xlu0 %1059 }
 0x175   :  { %v2201_v2 = vpop.eup %2200  ;;  %v1169_v51 = vadd.f32 %v3234_v47, %v1168_v1  ;;  %v965_v26 = vpop.f32.mrf.mxu1  ;;  %vm1098_vm13 = vcmp.eq.s32.totalorder %v1060_v4, 1 }
 0x176   :  { %v2203_v29 = vpop.eup %2202  ;;  %1976 = vmatmul.msk.f32.gmra.mxu3 %vm63_vm0, %v2201_v2  ;;  %v1513_v39 = vpop.f32.mrf.mxu0  ;;  %v966_v45 = vadd.f32 %v3256_v19, %v965_v26  ;;  %v285_v26 = vadd.f32 %v3101_v57, %v3197_v16 }
 0x177   :  { %v2205_v25 = vpop.eup %2204  ;;  %2210 = vtanh.f32 %v1169_v51  ;;  %v1514_v50 = vadd.f32 %v3220_v34, %v1513_v39  ;;  %v429_v54 = vsel %vm413_vm8, %v2203_v29, 0.0  ;;  %vm760_vm8 = vcmp.eq.s32.totalorder %v3236_v60, 1 }
 0x178   :  { %2212 = vtanh.f32 %v279_v56  ;;  %2019 = vmatmul.msk.f32.gmra.mxu1 %vm63_vm0, %v2205_v25  ;;  %v2207_v14 = vpop.eup %2206 }
 0x179   :  { %v620_v12 = vpop.f32.mrf.mxu3  ;;  %2214 = vtanh.f32 %v1514_v50 }
 0x17a   :  { %v2209_v46 = vpop.eup %2208  ;;  %v621_v53 = vadd.f32 %v3269_v44, %v620_v12  ;;  %2216 = vtanh.f32 %v963_v22 }
 0x17b   :  { %v771_v32 = vsel %vm755_vm9, %v2209_v46, %v429_v54  ;;  %v1063_v46 = vpop.permute.xlu1 %1062 }
 0x17c   :  { %v3332_v41 = vsel %vm1097_vm10, %v2207_v14, %v771_v32  ;;  %2218 = vtanh.f32 %v621_v53  ;;  %v1171_v5 = vpop.f32.mrf.mxu2  ;;  %vm1099_vm1 = vcmp.eq.s32.totalorder %v1063_v46, 1  ;;  %vm761_vm10 = vcmp.eq.s32.totalorder %v3248_v8, 1 }
 0x17d   :  { %v2211_v62 = vpop.eup %2210  ;;  %v1172_v24 = vadd.f32 %v3234_v47, %v1171_v5  ;;  %v968_v36 = vpop.f32.mrf.mxu1 }
 0x17e   :  { %v2213_v58 = vpop.eup %2212  ;;  %1977 = vmatmul.msk.f32.gmra.mxu3 %vm63_vm0, %v2211_v62  ;;  %v1516_v59 = vpop.f32.mrf.mxu0  ;;  %v969_v12 = vadd.f32 %v3256_v19, %v968_v36  ;;  %v288_v62 = vadd.f32 %v3101_v57, %v3223_v49 }
 0x17f   :  { %v2215_v48 = vpop.eup %2214  ;;  %2220 = vtanh.f32 %v1172_v24  ;;  %v1517_v17 = vadd.f32 %v3220_v34, %v1516_v59  ;;  %v430_v2 = vsel %vm414_vm11, %v2213_v58, 0.0  ;;  %v1066_v49 = vpop.permute.xlu2 %1065 }
 0x180   :  { %2222 = vtanh.f32 %v282_v15  ;;  %2020 = vmatmul.msk.f32.gmra.mxu1 %vm63_vm0, %v2215_v48  ;;  %v2217_v23 = vpop.eup %2216  ;;  %vm1100_vm3 = vcmp.eq.s32.totalorder %v1066_v49, 1 }
 0x181   :  { %v623_v56 = vpop.f32.mrf.mxu3  ;;  %2224 = vtanh.f32 %v1517_v17 }
 0x182   :  { %v2219_v1 = vpop.eup %2218  ;;  %v624_v51 = vadd.f32 %v3269_v44, %v623_v56  ;;  %2226 = vtanh.f32 %v966_v45 }
 0x183   :  { %v772_v10 = vsel %vm756_vm12, %v2219_v1, %v430_v2  ;;  %v1072_v2 = vpop.permute.xlu1 %1071  ;;  %vm762_vm12 = vcmp.eq.s32.totalorder %v3241_v0, 1 }
 0x184   :  { %v3344_v29 = vsel %vm1098_vm13, %v2217_v23, %v772_v10  ;;  %2228 = vtanh.f32 %v624_v51  ;;  %v1174_v3 = vpop.f32.mrf.mxu2  ;;  %vm1102_vm9 = vcmp.eq.s32.totalorder %v1072_v2, 1 }
 0x185   :  { %v2221_v39 = vpop.eup %2220  ;;  %v1175_v25 = vadd.f32 %v3234_v47, %v1174_v3  ;;  %v971_v22 = vpop.f32.mrf.mxu1 }
 0x186   :  { %v2223_v50 = vpop.eup %2222  ;;  %1978 = vmatmul.msk.f32.gmra.mxu3 %vm63_vm0, %v2221_v39  ;;  %v1519_v6 = vpop.f32.mrf.mxu0  ;;  %v972_v4 = vadd.f32 %v3256_v19, %v971_v22 }
 0x187   :  { %v2225_v14 = vpop.eup %2224  ;;  %2230 = vtanh.f32 %v1175_v25  ;;  %v1520_v16 = vadd.f32 %v3220_v34, %v1519_v6  ;;  %v431_v15 = vsel %vm415_vm14, %v2223_v50, 0.0  ;;  %vm763_vm14 = vcmp.eq.s32.totalorder %v3258_v52, 1 }
 0x188   :  { %2232 = vtanh.f32 %v285_v26  ;;  %2021 = vmatmul.msk.f32.gmra.mxu1 %vm63_vm0, %v2225_v14  ;;  %v2227_v54 = vpop.eup %2226 }
 0x189   :  { %v626_v53 = vpop.f32.mrf.mxu3  ;;  %2234 = vtanh.f32 %v1520_v16  ;;  %v1069_v16 = vpop.permute.xlu0 %1068 }
 0x18a   :  { %v2229_v32 = vpop.eup %2228  ;;  %v627_v5 = vadd.f32 %v3269_v44, %v626_v53  ;;  %2236 = vtanh.f32 %v969_v12  ;;  %vm1101_vm7 = vcmp.eq.s32.totalorder %v1069_v16, 1 }
 0x18b   :  { %v773_v30 = vsel %vm757_vm15, %v2229_v32, %v431_v15  ;;  %v1075_v32 = vpop.permute.xlu2 %1074 }
 0x18c   :  { %v3356_v24 = vsel %vm1099_vm1, %v2227_v54, %v773_v30  ;;  %2238 = vtanh.f32 %v627_v5  ;;  %v1177_v11 = vpop.f32.mrf.mxu2  ;;  %v3376_v30 = vpop.permute.xlu1 %1080  ;;  %vm1103_vm11 = vcmp.eq.s32.totalorder %v1075_v32, 1  ;;  %vm764_vm1 = vcmp.eq.s32.totalorder %v3278_v37, 1 }
 0x18d   :  { %v2231_v36 = vpop.eup %2230  ;;  %v1178_v58 = vadd.f32 %v3234_v47, %v1177_v11  ;;  %v974_v59 = vpop.f32.mrf.mxu1  ;;  %vm1105_vm15 = vcmp.eq.s32.totalorder %v3376_v30, 1 }
 0x18e   :  { %v2233_v48 = vpop.eup %2232  ;;  %1979 = vmatmul.msk.f32.gmra.mxu3 %vm63_vm0, %v2231_v36  ;;  %v1522_v45 = vpop.f32.mrf.mxu0  ;;  %v975_v55 = vadd.f32 %v3256_v19, %v974_v59 }
 0x18f   :  { %v2235_v17 = vpop.eup %2234  ;;  %2240 = vtanh.f32 %v1178_v58  ;;  %v1523_v57 = vadd.f32 %v3220_v34, %v1522_v45  ;;  %v432_v51 = vsel %vm416_vm2, %v2233_v48, 0.0 }
 0x190   :  { %2242 = vtanh.f32 %v288_v62  ;;  %2022 = vmatmul.msk.f32.gmra.mxu1 %vm63_vm0, %v2235_v17  ;;  %v2237_v23 = vpop.eup %2236 }
 0x191   :  { %v629_v56 = vpop.f32.mrf.mxu3  ;;  %2244 = vtanh.f32 %v1523_v57 }
 0x192   :  { %v2239_v1 = vpop.eup %2238  ;;  %v630_v43 = vadd.f32 %v3269_v44, %v629_v56  ;;  %2246 = vtanh.f32 %v972_v4 }
 0x193   :  { %v774_v10 = vsel %vm758_vm4, %v2239_v1, %v432_v51  ;;  %v3388_v51 = vpop.permute.xlu2 %1083 }
 0x194   :  { %v3366_v26 = vsel %vm1100_vm3, %v2237_v23, %v774_v10  ;;  %2248 = vtanh.f32 %v630_v43  ;;  %v1180_v3 = vpop.f32.mrf.mxu2  ;;  %v1078_v23 = vpop.permute.xlu0 %1077  ;;  %vm1106_vm2 = vcmp.eq.s32.totalorder %v3388_v51, 1  ;;  %vm765_vm3 = vcmp.eq.s32.totalorder %v3263_v35, 1 }
 0x195   :  { %v2241_v39 = vpop.eup %2240  ;;  %v1181_v25 = vadd.f32 %v3234_v47, %v1180_v3  ;;  %v977_v22 = vpop.f32.mrf.mxu1  ;;  %vm1104_vm13 = vcmp.eq.s32.totalorder %v1078_v23, 1 }
 0x196   :  { %v2243_v50 = vpop.eup %2242  ;;  %1980 = vmatmul.msk.f32.gmra.mxu3 %vm63_vm0, %v2241_v39  ;;  %v1525_v6 = vpop.f32.mrf.mxu0  ;;  %v978_v45 = vadd.f32 %v3256_v19, %v977_v22 }
 0x197   :  { %v2245_v14 = vpop.eup %2244  ;;  %2250 = vtanh.f32 %v1181_v25  ;;  %v1526_v12 = vadd.f32 %v3220_v34, %v1525_v6  ;;  %v433_v15 = vsel %vm417_vm5, %v2243_v50, 0.0  ;;  %v3393_v22 = vpop.permute.xlu1 %1089  ;;  %vm766_vm5 = vcmp.eq.s32.totalorder %v3283_v33, 1 }
 0x198   :  { %2023 = vmatmul.msk.f32.gmra.mxu1 %vm63_vm0, %v2245_v14  ;;  %v2247_v46 = vpop.eup %2246 }
 0x199   :  { %v632_v54 = vpop.f32.mrf.mxu3  ;;  %2252 = vtanh.f32 %v1526_v12 }
 0x19a   :  { %v2249_v53 = vpop.eup %2248  ;;  %v633_v5 = vadd.f32 %v3269_v44, %v632_v54  ;;  %2254 = vtanh.f32 %v975_v55 }
 0x19b   :  { %v775_v18 = vsel %vm759_vm6, %v2249_v53, %v433_v15  ;;  %vm1108_vm6 = vcmp.eq.s32.totalorder %v3393_v22, 1 }
 0x19c   :  { %v3378_v62 = vsel %vm1101_vm7, %v2247_v46, %v775_v18  ;;  %2256 = vtanh.f32 %v633_v5  ;;  %v1183_v11 = vpop.f32.mrf.mxu2  ;;  %v3402_v46 = vpop.permute.xlu0 %1086 }
 0x19d   :  { %v2251_v36 = vpop.eup %2250  ;;  %v1184_v58 = vadd.f32 %v3234_v47, %v1183_v11  ;;  %v980_v59 = vpop.f32.mrf.mxu1  ;;  %vm1107_vm4 = vcmp.eq.s32.totalorder %v3402_v46, 1 }
 0x19e   :  { %1981 = vmatmul.msk.f32.gmra.mxu3 %vm63_vm0, %v2251_v36  ;;  %v1528_v31 = vpop.f32.mrf.mxu0  ;;  %v3407_v11 = vpop.permute.xlu2 %1092 }
 0x19f   :  { %v2253_v48 = vpop.eup %2252  ;;  %2258 = vtanh.f32 %v1184_v58  ;;  %v1529_v17 = vadd.f32 %v3220_v34, %v1528_v31  ;;  %v3412_v58 = vpop.permute.xlu1 %1392  ;;  %vm1109_vm7 = vcmp.eq.s32.totalorder %v3407_v11, 1 }
 0x1a0   :  { %2024 = vmatmul.msk.f32.gmra.mxu1 %vm63_vm0, %v2253_v48  ;;  %v2255_v4 = vpop.eup %2254 }
 0x1a1   :  { %v635_v57 = vpop.f32.mrf.mxu3  ;;  %2260 = vtanh.f32 %v1529_v17 }
 0x1a2   :  { %v2257_v49 = vpop.eup %2256  ;;  %v636_v56 = vadd.f32 %v3269_v44, %v635_v57  ;;  %2262 = vtanh.f32 %v978_v45 }
 0x1a3   :  { %v776_v1 = vsel %vm760_vm8, %v2257_v49, %v3134_v9  ;;  %v981_v9 = vadd.f32 %v3256_v19, %v980_v59 }
 0x1a4   :  { %v3390_v43 = vsel %vm1102_vm9, %v2255_v4, %v776_v1  ;;  %2264 = vtanh.f32 %v636_v56  ;;  %v1186_v10 = vpop.f32.mrf.mxu2 }
 0x1a5   :  { %v2259_v3 = vpop.eup %2258  ;;  %v1187_v39 = vadd.f32 %v3234_v47, %v1186_v10  ;;  %v983_v25 = vpop.f32.mrf.mxu1 }
 0x1a6   :  { %1982 = vmatmul.msk.f32.gmra.mxu3 %vm63_vm0, %v2259_v3  ;;  %v1531_v60 = vpop.f32.mrf.mxu0  ;;  %v3421_v10 = vpop.permute.xlu0 %1389 }
 0x1a7   :  { %v2261_v50 = vpop.eup %2260  ;;  %2266 = vtanh.f32 %v1187_v39  ;;  %v1532_v2 = vadd.f32 %v3220_v34, %v1531_v60  ;;  %v3426_v39 = vpop.permute.xlu2 %1395  ;;  %vm1436_vm8 = vcmp.eq.s32.totalorder %v3421_v10, 1 }
 0x1a8   :  { %2025 = vmatmul.msk.f32.gmra.mxu1 %vm63_vm0, %v2261_v50  ;;  %v2263_v6 = vpop.eup %2262 }
 0x1a9   :  { %v638_v14 = vpop.f32.mrf.mxu3  ;;  %2268 = vtanh.f32 %v1532_v2 }
 0x1aa   :  { %v2265_v55 = vpop.eup %2264  ;;  %v639_v12 = vadd.f32 %v3269_v44, %v638_v14  ;;  %2270 = vtanh.f32 %v981_v9  ;;  %v3430_v9 = vpop.permute.xlu1 %1401 }
 0x1ab   :  { %v777_v16 = vsel %vm761_vm10, %v2265_v55, %v3155_v20  ;;  %v984_v20 = vadd.f32 %v3256_v19, %v983_v25  ;;  %vm1437_vm10 = vcmp.eq.s32.totalorder %v3412_v58, 1 }
 0x1ac   :  { %v3404_v54 = vsel %vm1103_vm11, %v2263_v6, %v777_v16  ;;  %2272 = vtanh.f32 %v639_v12  ;;  %v1189_v53 = vpop.f32.mrf.mxu2 }
 0x1ad   :  { %v2267_v15 = vpop.eup %2266  ;;  %v1190_v5 = vadd.f32 %v3234_v47, %v1189_v53  ;;  %v986_v18 = vpop.f32.mrf.mxu1 }
 0x1ae   :  { %1983 = vmatmul.msk.f32.gmra.mxu3 %vm63_vm0, %v2267_v15  ;;  %v1534_v8 = vpop.f32.mrf.mxu0  ;;  %v987_v23 = vadd.f32 %v3256_v19, %v986_v18  ;;  %v3441_v18 = vpop.permute.xlu0 %1398 }
 0x1af   :  { %v2269_v36 = vpop.eup %2268  ;;  %2274 = vtanh.f32 %v1190_v5  ;;  %v1535_v32 = vadd.f32 %v3220_v34, %v1534_v8 }
 0x1b0   :  { %2026 = vmatmul.msk.f32.gmra.mxu1 %vm63_vm0, %v2269_v36  ;;  %v2271_v59 = vpop.eup %2270 }
 0x1b1   :  { %v641_v31 = vpop.f32.mrf.mxu3  ;;  %2276 = vtanh.f32 %v1535_v32 }
 0x1b2   :  { %v2273_v48 = vpop.eup %2272  ;;  %v642_v45 = vadd.f32 %v3269_v44, %v641_v31  ;;  %2278 = vtanh.f32 %v984_v20  ;;  %v3445_v20 = vpop.permute.xlu2 %1404 }
 0x1b3   :  { %v778_v17 = vsel %vm762_vm12, %v2273_v48, %v3173_v42  ;;  %vm1438_vm12 = vcmp.eq.s32.totalorder %v3426_v39, 1 }
 0x1b4   :  { %v3418_v4 = vsel %vm1104_vm13, %v2271_v59, %v778_v17  ;;  %2280 = vtanh.f32 %v642_v45  ;;  %v1192_v57 = vpop.f32.mrf.mxu2 }
 0x1b5   :  { %v2275_v49 = vpop.eup %2274  ;;  %v1193_v56 = vadd.f32 %v3234_v47, %v1192_v57  ;;  %v989_v1 = vpop.f32.mrf.mxu1 }
 0x1b6   :  { %1984 = vmatmul.msk.f32.gmra.mxu3 %vm63_vm0, %v2275_v49  ;;  %v1537_v3 = vpop.f32.mrf.mxu0  ;;  %v990_v5 = vadd.f32 %v3256_v19, %v989_v1  ;;  %v3459_v1 = vpop.permute.xlu0 %1407 }
 0x1b7   :  { %v2277_v0 = vpop.eup %2276  ;;  %2282 = vtanh.f32 %v1193_v56  ;;  %v1538_v42 = vadd.f32 %v3220_v34, %v1537_v3 }
 0x1b8   :  { %2027 = vmatmul.msk.f32.gmra.mxu1 %vm63_vm0, %v2277_v0  ;;  %v2279_v25 = vpop.eup %2278 }
 0x1b9   :  { %v644_v60 = vpop.f32.mrf.mxu3  ;;  %2284 = vtanh.f32 %v1538_v42 }
 0x1ba   :  { %v2281_v50 = vpop.eup %2280  ;;  %v645_v2 = vadd.f32 %v3269_v44, %v644_v60  ;;  %2286 = vtanh.f32 %v987_v23  ;;  %v3464_v0 = vpop.permute.xlu2 %1413 }
 0x1bb   :  { %v779_v6 = vsel %vm763_vm14, %v2281_v50, %v3194_v7  ;;  %vm1439_vm14 = vcmp.eq.s32.totalorder %v3441_v18, 1 }
 0x1bc   :  { %v3435_v14 = vsel %vm1105_vm15, %v2279_v25, %v779_v6  ;;  %2288 = vtanh.f32 %v645_v2  ;;  %v1195_v55 = vpop.f32.mrf.mxu2 }
 0x1bd   :  { %v2283_v12 = vpop.eup %2282  ;;  %v1196_v16 = vadd.f32 %v3234_v47, %v1195_v55  ;;  %v992_v53 = vpop.f32.mrf.mxu1  ;;  %v3479_v55 = vld [vmem:[%s3622_s5 + $0x4] ss:$0 sm:$0xff] }
 0x1be   :  { %1985 = vmatmul.msk.f32.gmra.mxu3 %vm63_vm0, %v2283_v12  ;;  %v1540_v52 = vpop.f32.mrf.mxu0  ;;  %v993_v49 = vadd.f32 %v3256_v19, %v992_v53  ;;  %v3481_v12 = vpop.permute.xlu0 %1416 }
 0x1bf   :  { %v2285_v15 = vpop.eup %2284  ;;  %2290 = vtanh.f32 %v1196_v16  ;;  %v1541_v30 = vadd.f32 %v3220_v34, %v1540_v52  ;;  %v3450_v34 = vpop.permute.xlu1 %1410 }
 0x1c0   :  { %2028 = vmatmul.msk.f32.gmra.mxu1 %vm63_vm0, %v2285_v15  ;;  %v2287_v7 = vpop.eup %2286 }
 0x1c1   :  { %v647_v8 = vpop.f32.mrf.mxu3  ;;  %2292 = vtanh.f32 %v1541_v30 }
 0x1c2   :  { %v2289_v36 = vpop.eup %2288  ;;  %v648_v32 = vadd.f32 %v3269_v44, %v647_v8  ;;  %2294 = vtanh.f32 %v990_v5  ;;  %v3485_v53 = vpop.permute.xlu2 %1422 }
 0x1c3   :  { %v780_v59 = vsel %vm764_vm1, %v2289_v36, %v3215_v13  ;;  %vm1440_vm1 = vcmp.eq.s32.totalorder %v3430_v9, 1 }
 0x1c4   :  { %v3452_v31 = vsel %vm1106_vm2, %v2287_v7, %v780_v59  ;;  %2296 = vtanh.f32 %v648_v32  ;;  %v1198_v48 = vpop.f32.mrf.mxu2 }
 0x1c5   :  { %v2291_v45 = vpop.eup %2290  ;;  %v1199_v17 = vadd.f32 %v3234_v47, %v1198_v48  ;;  %v995_v57 = vpop.f32.mrf.mxu1 }
 0x1c6   :  { %1986 = vmatmul.msk.f32.gmra.mxu3 %vm63_vm0, %v2291_v45  ;;  %v996_v35 = vadd.f32 %v3256_v19, %v995_v57  ;;  %v3501_v36 = vpop.permute.xlu0 %1425 }
 0x1c7   :  { %v2293_v37 = vpop.eup %2292  ;;  %2298 = vtanh.f32 %v1199_v17  ;;  %v3468_v60 = vpop.permute.xlu1 %1419 }
 0x1c8   :  { %2029 = vmatmul.msk.f32.gmra.mxu1 %vm63_vm0, %v2293_v37  ;;  %v2295_v13 = vpop.eup %2294  ;;  %2300 = vtanh.f32 %v993_v49 }
 0x1c9   :  { %v650_v51 = vpop.f32.mrf.mxu3 }
 0x1ca   :  { %v2297_v56 = vpop.eup %2296  ;;  %v651_v3 = vadd.f32 %v3269_v44, %v650_v51  ;;  %v3504_v59 = vpop.permute.xlu2 %1431 }
 0x1cb   :  { %v781_v47 = vsel %vm765_vm3, %v2297_v56, %v3239_v63  ;;  %vm1441_vm3 = vcmp.eq.s32.totalorder %v3445_v20, 1 }
 0x1cc   :  { %v3466_v23 = vsel %vm1107_vm4, %v2295_v13, %v781_v47  ;;  %2302 = vtanh.f32 %v651_v3 }
 0x1cd   :  { %v2299_v42 = vpop.eup %2298  ;;  %v1634_v25 = vpop.f32.mrf.mxu1  ;;  %2304 = vtanh.f32 %v996_v35 }
 0x1ce   :  { %1987 = vmatmul.msk.f32.gmra.mxu3 %vm63_vm0, %v2299_v42  ;;  %v2301_v50 = vpop.eup %2300  ;;  %vm767_vm0 = vcmp.eq.s32.totalorder %v3297_v21, 1  ;;  %v3513_v13 = vpop.permute.xlu0 %1434 }
 0x1cf   :  { %v3493_v33 = vpop.permute.xlu1 %1428 }
 0x1d1   :  { %v653_v2 = vpop.f32.mrf.mxu3 }
 0x1d2   :  { %v2303_v6 = vpop.eup %2302  ;;  %v654_v63 = vadd.f32 %v3269_v44, %v653_v2  ;;  %v3490_v44 = vld [vmem:[%s3622_s5 + $0x3] ss:$0 sm:$0xff]  ;;  %v1735_v3 = vpop.permute.xlu2 %1734 }
 0x1d3   :  { %v782_v46 = vsel %vm766_vm5, %v2303_v6, %v3251_v40  ;;  %v1635_v40 = vadd.f32 %v3479_v55, %v1634_v25  ;;  %v2305_v22 = vpop.eup %2304  ;;  %vm1779_vm11 = vcmp.eq.s32.totalorder %v1735_v3, 1  ;;  %vm1442_vm5 = vcmp.eq.s32.totalorder %v3459_v1, 1 }
 0x1d4   :  { %v3483_v19 = vsel %vm1108_vm6, %v2301_v50, %v782_v46  ;;  %2306 = vtanh.f32 %v654_v63 }
 0x1d5   :  { %v1637_v16 = vpop.f32.mrf.mxu1  ;;  %2308 = vtanh.f32 %v1635_v40 }
 0x1d6   :  { %v1638_v32 = vadd.f32 %v3479_v55, %v1637_v16  ;;  %v1738_v58 = vpop.permute.xlu0 %1737 }
 0x1d7   :  { %v1732_v17 = vpop.permute.xlu1 %1731  ;;  %vm1780_vm13 = vcmp.eq.s32.totalorder %v1738_v58, 1 }
 0x1d8   :  { %vm1778_vm9 = vcmp.eq.s32.totalorder %v1732_v17, 1 }
 0x1d9   :  { %v1292_v52 = vpop.f32.mrf.mxu3 }
 0x1da   :  { %v2307_v15 = vpop.eup %2306  ;;  %v1293_v5 = vadd.f32 %v3490_v44, %v1292_v52  ;;  %v1744_v18 = vpop.permute.xlu2 %1743 }
 0x1db   :  { %v783_v30 = vsel %vm767_vm0, %v2307_v15, %v3276_v61  ;;  %v2309_v48 = vpop.eup %2308  ;;  %vm1782_vm2 = vcmp.eq.s32.totalorder %v1744_v18, 1  ;;  %vm1443_vm0 = vcmp.eq.s32.totalorder %v3450_v34, 1 }
 0x1dc   :  { %v3499_v7 = vsel %vm1109_vm7, %v2305_v22, %v783_v30  ;;  %2310 = vtanh.f32 %v1293_v5 }
 0x1dd   :  { %v1640_v8 = vpop.f32.mrf.mxu1  ;;  %2312 = vtanh.f32 %v1638_v32 }
 0x1de   :  { %v1641_v49 = vadd.f32 %v3479_v55, %v1640_v8  ;;  %v1747_v9 = vpop.permute.xlu0 %1746 }
 0x1df   :  { %v1741_v39 = vpop.permute.xlu1 %1740  ;;  %vm1783_vm4 = vcmp.eq.s32.totalorder %v1747_v9, 1 }
 0x1e0   :  { %vm1781_vm15 = vcmp.eq.s32.totalorder %v1741_v39, 1 }
 0x1e1   :  { %v1295_v45 = vpop.f32.mrf.mxu3 }
 0x1e2   :  { %v2311_v21 = vpop.eup %2310  ;;  %v1296_v11 = vadd.f32 %v3490_v44, %v1295_v45  ;;  %v1753_v1 = vpop.permute.xlu2 %1752 }
 0x1e3   :  { %v1452_v61 = vsel %vm1436_vm8, %v2311_v21, %v3294_v38  ;;  %v2313_v51 = vpop.eup %2312  ;;  %vm1785_vm7 = vcmp.eq.s32.totalorder %v1753_v1, 1  ;;  %vm1444_vm8 = vcmp.eq.s32.totalorder %v3464_v0, 1 }
 0x1e4   :  { %v1794_v57 = vsel %vm1778_vm9, %v2309_v48, %v1452_v61  ;;  %2314 = vtanh.f32 %v1296_v11 }
 0x1e5   :  { %1810 = vst [vmem:[%s3623_s6] sm:$0xff] %v1794_v57  ;;  %v1643_v37 = vpop.f32.mrf.mxu1  ;;  %2316 = vtanh.f32 %v1641_v49 }
 0x1e6   :  { %v1644_v35 = vadd.f32 %v3479_v55, %v1643_v37  ;;  %v1756_v34 = vpop.permute.xlu0 %1755 }
 0x1e7   :  { %v1750_v20 = vpop.permute.xlu1 %1749  ;;  %vm1786_vm9 = vcmp.eq.s32.totalorder %v1756_v34, 1 }
 0x1e8   :  { %vm1784_vm6 = vcmp.eq.s32.totalorder %v1750_v20, 1 }
 0x1e9   :  { %v1298_v10 = vpop.f32.mrf.mxu3 }
 0x1ea   :  { %v2315_v56 = vpop.eup %2314  ;;  %v1299_v38 = vadd.f32 %v3490_v44, %v1298_v10 }
 0x1eb   :  { %v1453_v47 = vsel %vm1437_vm10, %v2315_v56, %v3308_v27  ;;  %v2317_v50 = vpop.eup %2316  ;;  %vm1445_vm10 = vcmp.eq.s32.totalorder %v3481_v12, 1  ;;  %v1762_v12 = vpop.permute.xlu2 %1761 }
 0x1ec   :  { %v1795_v42 = vsel %vm1779_vm11, %v2313_v51, %v1453_v47  ;;  %2318 = vtanh.f32 %v1299_v38 }
 0x1ed   :  { %1811 = vst [vmem:[%s3623_s6 + $0x8] sm:$0xff] %v1795_v42  ;;  %v1646_v25 = vpop.f32.mrf.mxu1  ;;  %2320 = vtanh.f32 %v1644_v35 }
 0x1ee   :  { %v1647_v40 = vadd.f32 %v3479_v55, %v1646_v25 }
 0x1ef   :  { %v1759_v0 = vpop.permute.xlu1 %1758 }
 0x1f0   :  { %vm1787_vm11 = vcmp.eq.s32.totalorder %v1759_v0, 1 }
 0x1f1   :  { %v1301_v2 = vpop.f32.mrf.mxu3 }
 0x1f2   :  { %v2319_v6 = vpop.eup %2318  ;;  %v1302_v63 = vadd.f32 %v3490_v44, %v1301_v2 }
 0x1f3   :  { %v1454_v27 = vsel %vm1438_vm12, %v2319_v6, %v3320_v28  ;;  %v2321_v22 = vpop.eup %2320  ;;  %vm1446_vm12 = vcmp.eq.s32.totalorder %v3468_v60, 1  ;;  %v1765_v60 = vpop.permute.xlu0 %1764 }
 0x1f4   :  { %v1796_v46 = vsel %vm1780_vm13, %v2317_v50, %v1454_v27  ;;  %2322 = vtanh.f32 %v1302_v63  ;;  %vm1788_vm13 = vcmp.eq.s32.totalorder %v1762_v12, 1 }
 0x1f5   :  { %1812 = vst [vmem:[%s3623_s6 + $0x10] sm:$0xff] %v1796_v46  ;;  %v1649_v16 = vpop.f32.mrf.mxu1  ;;  %2324 = vtanh.f32 %v1647_v40 }
 0x1f6   :  { %v1650_v32 = vadd.f32 %v3479_v55, %v1649_v16 }
 0x1f9   :  { %v1304_v52 = vpop.f32.mrf.mxu3 }
 0x1fa   :  { %v2323_v15 = vpop.eup %2322  ;;  %v1305_v5 = vadd.f32 %v3490_v44, %v1304_v52 }
 0x1fb   :  { %v1455_v28 = vsel %vm1439_vm14, %v2323_v15, %v3332_v41  ;;  %v2325_v48 = vpop.eup %2324  ;;  %vm1447_vm14 = vcmp.eq.s32.totalorder %v3485_v53, 1  ;;  %v1768_v53 = vpop.permute.xlu1 %1767 }
 0x1fc   :  { %v1797_v30 = vsel %vm1781_vm15, %v2321_v22, %v1455_v28  ;;  %2326 = vtanh.f32 %v1305_v5  ;;  %vm1789_vm15 = vcmp.eq.s32.totalorder %v1765_v60, 1 }
 0x1fd   :  { %1813 = vst [vmem:[%s3623_s6 + $0x18] sm:$0xff] %v1797_v30  ;;  %v1652_v8 = vpop.f32.mrf.mxu1  ;;  %2328 = vtanh.f32 %v1650_v32 }
 0x1fe   :  { %v1653_v57 = vadd.f32 %v3479_v55, %v1652_v8 }
 0x201   :  { %v1307_v45 = vpop.f32.mrf.mxu3 }
 0x202   :  { %v2327_v21 = vpop.eup %2326  ;;  %v1308_v17 = vadd.f32 %v3490_v44, %v1307_v45 }
 0x203   :  { %v1456_v41 = vsel %vm1440_vm1, %v2327_v21, %v3344_v29  ;;  %v2329_v37 = vpop.eup %2328  ;;  %vm1448_vm1 = vcmp.eq.s32.totalorder %v3501_v36, 1 }
 0x204   :  { %v1798_v11 = vsel %vm1782_vm2, %v2325_v48, %v1456_v41  ;;  %2330 = vtanh.f32 %v1308_v17  ;;  %vm1790_vm2 = vcmp.eq.s32.totalorder %v1768_v53, 1 }
 0x205   :  { %1814 = vst [vmem:[%s3623_s6 + $0x20] sm:$0xff] %v1798_v11  ;;  %v1655_v61 = vpop.f32.mrf.mxu1  ;;  %2332 = vtanh.f32 %v1653_v57 }
 0x206   :  { %v1656_v38 = vadd.f32 %v3479_v55, %v1655_v61 }
 0x209   :  { %v1310_v49 = vpop.f32.mrf.mxu3 }
 0x20a   :  { %v2331_v51 = vpop.eup %2330  ;;  %v1311_v10 = vadd.f32 %v3490_v44, %v1310_v49 }
 0x20b   :  { %v1457_v29 = vsel %vm1441_vm3, %v2331_v51, %v3356_v24  ;;  %v2333_v47 = vpop.eup %2332  ;;  %vm1449_vm3 = vcmp.eq.s32.totalorder %v3493_v33, 1 }
 0x20c   :  { %v1799_v56 = vsel %vm1783_vm4, %v2329_v37, %v1457_v29  ;;  %2334 = vtanh.f32 %v1311_v10 }
 0x20d   :  { %1815 = vst [vmem:[%s3623_s6 + $0x28] sm:$0xff] %v1799_v56  ;;  %v1658_v3 = vpop.f32.mrf.mxu1  ;;  %2336 = vtanh.f32 %v1656_v38 }
 0x20e   :  { %v1659_v6 = vadd.f32 %v3479_v55, %v1658_v3 }
 0x211   :  { %v1313_v42 = vpop.f32.mrf.mxu3 }
 0x212   :  { %v2335_v25 = vpop.eup %2334  ;;  %v1314_v35 = vadd.f32 %v3490_v44, %v1313_v42 }
 0x213   :  { %v1458_v24 = vsel %vm1442_vm5, %v2335_v25, %v3366_v26  ;;  %v2337_v58 = vpop.eup %2336  ;;  %vm1450_vm5 = vcmp.eq.s32.totalorder %v3504_v59, 1 }
 0x214   :  { %v1800_v50 = vsel %vm1784_vm6, %v2333_v47, %v1458_v24  ;;  %2338 = vtanh.f32 %v1314_v35 }
 0x215   :  { %1816 = vst [vmem:[%s3623_s6 + $0x30] sm:$0xff] %v1800_v50  ;;  %v1661_v2 = vpop.f32.mrf.mxu1  ;;  %2340 = vtanh.f32 %v1659_v6  ;;  %v1771_v6 = vpop.permute.xlu2 %1770 }
 0x216   :  { %v1662_v22 = vadd.f32 %v3479_v55, %v1661_v2  ;;  %vm1791_vm4 = vcmp.eq.s32.totalorder %v1771_v6, 1 }
 0x219   :  { %v1316_v63 = vpop.f32.mrf.mxu3 }
 0x21a   :  { %v2339_v27 = vpop.eup %2338  ;;  %v1317_v46 = vadd.f32 %v3490_v44, %v1316_v63 }
 0x21b   :  { %v1459_v26 = vsel %vm1443_vm0, %v2339_v27, %v3378_v62  ;;  %v2341_v52 = vpop.eup %2340  ;;  %vm1451_vm0 = vcmp.eq.s32.totalorder %v3513_v13, 1 }
 0x21c   :  { %v1801_v16 = vsel %vm1785_vm7, %v2337_v58, %v1459_v26  ;;  %2342 = vtanh.f32 %v1317_v46 }
 0x21d   :  { %1817 = vst [vmem:[%s3623_s6 + $0x38] sm:$0xff] %v1801_v16  ;;  %v1664_v40 = vpop.f32.mrf.mxu1  ;;  %2344 = vtanh.f32 %v1662_v22  ;;  %v1774_v16 = vpop.permute.xlu0 %1773 }
 0x21e   :  { %v1665_v8 = vadd.f32 %v3479_v55, %v1664_v40  ;;  %vm1792_vm6 = vcmp.eq.s32.totalorder %v1774_v16, 1 }
 0x221   :  { %v1319_v15 = vpop.f32.mrf.mxu3 }
 0x222   :  { %v2343_v39 = vpop.eup %2342  ;;  %v1320_v5 = vadd.f32 %v3490_v44, %v1319_v15 }
 0x223   :  { %v1460_v62 = vsel %vm1444_vm8, %v2343_v39, %v3390_v43  ;;  %v2345_v32 = vpop.eup %2344  ;;  %v1777_v39 = vpop.permute.xlu1 %1776 }
 0x224   :  { %v1802_v28 = vsel %vm1786_vm9, %v2341_v52, %v1460_v62  ;;  %2346 = vtanh.f32 %v1320_v5  ;;  %vm1793_vm7 = vcmp.eq.s32.totalorder %v1777_v39, 1 }
 0x225   :  { %1818 = vst [vmem:[%s3623_s6 + $0x40] sm:$0xff] %v1802_v28  ;;  %v1667_v30 = vpop.f32.mrf.mxu1  ;;  %2348 = vtanh.f32 %v1665_v8 }
 0x226   :  { %v1668_v41 = vadd.f32 %v3479_v55, %v1667_v30 }
 0x229   :  { %v1322_v48 = vpop.f32.mrf.mxu3 }
 0x22a   :  { %v2347_v45 = vpop.eup %2346  ;;  %v1323_v21 = vadd.f32 %v3490_v44, %v1322_v48 }
 0x22b   :  { %v1461_v43 = vsel %vm1445_vm10, %v2347_v45, %v3404_v54  ;;  %v2349_v11 = vpop.eup %2348 }
 0x22c   :  { %v1803_v18 = vsel %vm1787_vm11, %v2345_v32, %v1461_v43  ;;  %2350 = vtanh.f32 %v1323_v21 }
 0x22d   :  { %1819 = vst [vmem:[%s3623_s6 + $0x48] sm:$0xff] %v1803_v18  ;;  %v1670_v17 = vpop.f32.mrf.mxu1  ;;  %2352 = vtanh.f32 %v1668_v41 }
 0x22e   :  { %v1671_v51 = vadd.f32 %v3479_v55, %v1670_v17 }
 0x231   :  { %v1325_v61 = vpop.f32.mrf.mxu3 }
 0x232   :  { %v2351_v57 = vpop.eup %2350  ;;  %v1326_v37 = vadd.f32 %v3490_v44, %v1325_v61 }
 0x233   :  { %v1462_v54 = vsel %vm1446_vm12, %v2351_v57, %v3418_v4  ;;  %v2353_v10 = vpop.eup %2352 }
 0x234   :  { %v1804_v49 = vsel %vm1788_vm13, %v2349_v11, %v1462_v54  ;;  %2354 = vtanh.f32 %v1326_v37 }
 0x235   :  { %1820 = vst [vmem:[%s3623_s6 + $0x50] sm:$0xff] %v1804_v49  ;;  %v1673_v9 = vpop.f32.mrf.mxu1  ;;  %2356 = vtanh.f32 %v1671_v51 }
 0x236   :  { %v1674_v47 = vadd.f32 %v3479_v55, %v1673_v9 }
 0x239   :  { %v1328_v29 = vpop.f32.mrf.mxu3 }
 0x23a   :  { %v2355_v56 = vpop.eup %2354  ;;  %v1329_v3 = vadd.f32 %v3490_v44, %v1328_v29 }
 0x23b   :  { %v1463_v4 = vsel %vm1447_vm14, %v2355_v56, %v3435_v14  ;;  %v2357_v42 = vpop.eup %2356 }
 0x23c   :  { %v1805_v38 = vsel %vm1789_vm15, %v2353_v10, %v1463_v4  ;;  %2358 = vtanh.f32 %v1329_v3 }
 0x23d   :  { %1821 = vst [vmem:[%s3623_s6 + $0x58] sm:$0xff] %v1805_v38  ;;  %v1676_v24 = vpop.f32.mrf.mxu1  ;;  %2360 = vtanh.f32 %v1674_v47 }
 0x23e   :  { %v1677_v2 = vadd.f32 %v3479_v55, %v1676_v24 }
 0x241   :  { %v1331_v25 = vpop.f32.mrf.mxu3 }
 0x242   :  { %v2359_v20 = vpop.eup %2358  ;;  %v1332_v35 = vadd.f32 %v3490_v44, %v1331_v25 }
 0x243   :  { %v1464_v14 = vsel %vm1448_vm1, %v2359_v20, %v3452_v31  ;;  %v2361_v58 = vpop.eup %2360 }
 0x244   :  { %v1806_v50 = vsel %vm1790_vm2, %v2357_v42, %v1464_v14  ;;  %2362 = vtanh.f32 %v1332_v35 }
 0x245   :  { %1822 = vst [vmem:[%s3623_s6 + $0x60] sm:$0xff] %v1806_v50  ;;  %2364 = vtanh.f32 %v1677_v2  ;;  %v1679_v46 = vpop.f32.mrf.mxu1 }
 0x246   :  { %v1680_v26 = vadd.f32 %v3479_v55, %v1679_v46 }
 0x249   :  { %v1334_v63 = vpop.f32.mrf.mxu3 }
 0x24a   :  { %v2363_v36 = vpop.eup %2362  ;;  %v1335_v27 = vadd.f32 %v3490_v44, %v1334_v63 }
 0x24b   :  { %v1465_v31 = vsel %vm1449_vm3, %v2363_v36, %v3466_v23  ;;  %v2365_v40 = vpop.eup %2364 }
 0x24c   :  { %v1807_v1 = vsel %vm1791_vm4, %v2361_v58, %v1465_v31  ;;  %2366 = vtanh.f32 %v1335_v27 }
 0x24d   :  { %1823 = vst [vmem:[%s3623_s6 + $0x68] sm:$0xff] %v1807_v1  ;;  %2368 = vtanh.f32 %v1680_v26 }
 0x251   :  { %v1337_v22 = vpop.f32.mrf.mxu3 }
 0x252   :  { %v2367_v52 = vpop.eup %2366  ;;  %v1338_v33 = vadd.f32 %v3490_v44, %v1337_v22 }
 0x253   :  { %v1466_v23 = vsel %vm1450_vm5, %v2367_v52, %v3483_v19  ;;  %v2369_v55 = vpop.eup %2368 }
 0x254   :  { %v1808_v15 = vsel %vm1792_vm6, %v2365_v40, %v1466_v23  ;;  %2370 = vtanh.f32 %v1338_v33 }
 0x255   :  { %1824 = vst [vmem:[%s3623_s6 + $0x70] sm:$0xff] %v1808_v15 }
 0x25a   :  { %v2371_v34 = vpop.eup %2370 }
 0x25b   :  { %v1467_v59 = vsel %vm1451_vm0, %v2371_v34, %v3499_v7 }
 0x25c   :  { %v1809_v5 = vsel %vm1793_vm7, %v2369_v55, %v1467_v59 }
 0x25d   :  { %1825 = vst [vmem:[%s3623_s6 + $0x78] sm:$0xff] %v1809_v5 }

</bundles_post_ra>
